<compile_context>
chip_gen: v6e
topology: v6e:2x2x1
jax: 0.10.0
libtpu: 0.0.40
codegen_flags: <defaults>
</compile_context>

<pallas_src>
import jax
import jax.numpy as jnp
from jax import lax
from jax.experimental import pallas as pl
from jax.experimental.pallas import tpu as pltpu

BLOCK_SIZE = 32  # causal-mask window from the PyTorch module


def _single_head_attn_kernel(x_ref, wqkv_ref, o_ref):
    # x_ref   : (BB, T, C)   f32 or bf16 -- BB batch elements
    # wqkv_ref: (C, 3H)      f32 or bf16 -- fused [Wq | Wk | Wv] (x @ W layout)
    # o_ref   : (BB, T*H)    f32         -- lane-dense output block
    BB, T, C = x_ref.shape
    H = wqkv_ref.shape[1] // 3
    mxu_dtype = x_ref.dtype

    # Fused QKV projection: one fat matmul, M = BB*T rows, N = 3H cols.
    x2d = x_ref[...].reshape(BB * T, C)
    qkv = jnp.dot(x2d, wqkv_ref[...],
                  preferred_element_type=jnp.float32).reshape(BB, T, 3 * H)

    q = qkv[:, :, 0 * H:1 * H].astype(mxu_dtype)
    k = qkv[:, :, 1 * H:2 * H].astype(mxu_dtype)
    v = qkv[:, :, 2 * H:3 * H].astype(mxu_dtype)

    # PyTorch scales by C**-0.5 (n_embd, not head_dim) -- intentional fidelity.
    scale = C ** -0.5
    scores = jnp.einsum("bqd,bkd->bqk", q, k,
                        preferred_element_type=jnp.float32) * scale  # (BB,T,T) f32

    # Causal mask: keep col <= row (every row keeps its diagonal, so no all -inf rows).
    row = lax.broadcasted_iota(jnp.int32, (T, T), 0)
    col = lax.broadcasted_iota(jnp.int32, (T, T), 1)
    scores = jnp.where((col <= row)[None, :, :], scores, -jnp.inf)

    # Numerically stable softmax along keys, all in f32.
    m = jnp.max(scores, axis=-1, keepdims=True)
    p = jnp.exp(scores - m)
    denom = jnp.sum(p, axis=-1, keepdims=True)
    wei = p * pl.reciprocal(denom, approx=True)

    out = jnp.einsum("bqk,bkd->bqd", wei.astype(mxu_dtype), v,
                     preferred_element_type=jnp.float32)             # (BB,T,H) f32

    # Lane-dense store: collapse (T, H) -> T*H so the vst is unmasked.
    o_ref[...] = out.reshape(BB, T * H).astype(o_ref.dtype)


def single_head_attention(x: jax.Array, w_q: jax.Array, w_k: jax.Array,
                          w_v: jax.Array, *, bb: int | None = None,
                          mxu_dtype=jnp.float32) -> jax.Array:
    """
    x   : (B, T, C) float32, T <= BLOCK_SIZE
    w_* : (H, C) float32  (PyTorch nn.Linear layout: out_features x in_features)
    ->    (B, T, H) float32
    """
    B, T, C = x.shape
    H = w_q.shape[0]
    assert T <= BLOCK_SIZE, "T must not exceed block_size (causal mask window)"

    # Fuse the three projections into one (C, 3H) weight: x @ [Wq^T | Wk^T | Wv^T].
    w_qkv = jnp.concatenate([w_q.T, w_k.T, w_v.T], axis=1).astype(mxu_dtype)
    x_in = x.astype(mxu_dtype)

    # Batch-block size: largest divisor of B keeping grid length >= 2 (megacore),
    # which for T=32 gives BB*T >= 256 once B >= 16.
    if bb is None:
        bb = 1
        for d in range(1, B + 1):
            if B % d == 0 and d <= max(1, B // 2):
                bb = d
    assert B % bb == 0, "bb must divide batch size"
    grid = (B // bb,)

    out_flat = pl.pallas_call(
        _single_head_attn_kernel,
        out_shape=jax.ShapeDtypeStruct((B, T * H), jnp.float32),
        grid_spec=pltpu.PrefetchScalarGridSpec(
            num_scalar_prefetch=0,
            grid=grid,
            in_specs=[
                pl.BlockSpec((bb, T, C), lambda b: (b, 0, 0)),   # x block
                pl.BlockSpec((C, 3 * H), lambda b: (0, 0)),      # fused weights (resident)
            ],
            out_specs=pl.BlockSpec((bb, T * H), lambda b: (b, 0)),
        ),
        compiler_params=pltpu.CompilerParams(
            dimension_semantics=("parallel",),
        ),
    )(x_in, w_qkv)

    return out_flat.reshape(B, T, H)


if __name__ == "__main__":
    key = jax.random.PRNGKey(0)
    kx, kq, kk, kv = jax.random.split(key, 4)

    B = 16                # batch (grid of 2 steps with BB=8)
    T = BLOCK_SIZE        # seq length == block_size (full causal mask)
    C = 64                # n_embd
    H = 32                # head_dim

    x = jax.random.normal(kx, (B, T, C), dtype=jnp.float32)
    # nn.Linear(C, H, bias=False) weight layout is (H, C), init ~ U(-1/sqrt(C), 1/sqrt(C))
    bound = 1.0 / (C ** 0.5)
    w_q = jax.random.uniform(kq, (H, C), jnp.float32, -bound, bound)
    w_k = jax.random.uniform(kk, (H, C), jnp.float32, -bound, bound)
    w_v = jax.random.uniform(kv, (H, C), jnp.float32, -bound, bound)

    # Pure-JAX reference of the PyTorch forward (f32).
    q = x @ w_q.T
    k = x @ w_k.T
    v = x @ w_v.T
    wei = jnp.einsum("btd,bsd->bts", q, k) * (C ** -0.5)
    mask = jnp.tril(jnp.ones((T, T), dtype=bool))
    wei = jnp.where(mask[None], wei, -jnp.inf)
    wei = jax.nn.softmax(wei, axis=-1)
    ref = jnp.einsum("bts,bsd->btd", wei, v)

    # f32 MXU path (tight tolerance; approx reciprocal only).
    out = single_head_attention(x, w_q, w_k, w_v)
    jax.block_until_ready(out)
    assert out.shape == (B, T, H)
    assert jnp.allclose(out, ref, atol=5e-3, rtol=5e-3), "f32 kernel mismatch vs reference"

    # bf16 MXU-operand path (v6e/v7x fast path); f32 accumulation, looser tolerance.
    out_bf16 = single_head_attention(x, w_q, w_k, w_v, mxu_dtype=jnp.bfloat16)
    jax.block_until_ready(out_bf16)
    assert jnp.allclose(out_bf16, ref, atol=1e-1, rtol=1e-1), "bf16 kernel mismatch vs reference"

    print("KERNEL_OK")
</pallas_src>

<mosaic_0001>
module attributes {stable_mosaic.version = 11 : i64} {
  func.func @_single_head_attn_kernel(%arg0: i32, %arg1: memref<8x32x64xf32, #tpu.memory_space<vmem>>, %arg2: memref<64x96xf32, #tpu.memory_space<vmem>>, %arg3: memref<8x1024xf32, #tpu.memory_space<vmem>>) attributes {dimension_semantics = [#tpu.dimension_semantics<parallel>], iteration_bounds = array<i64: 2>, scalar_prefetch = 0 : i64, scratch_operands = 0 : i64, tpu.core_type = #tpu.core_type<tc>, window_params = [{transform_indices = @transform_0, window_bounds = array<i64: 8, 32, 64>}, {pipeline_mode = #tpu.pipeline_mode<synchronous>, transform_indices = @transform_1, window_bounds = array<i64: 64, 96>}, {transform_indices = @transform_2, window_bounds = array<i64: 8, 1024>}]} {
    %c0 = arith.constant 0 : index
    %c0_0 = arith.constant 0 : index
    %c0_1 = arith.constant 0 : index
    %0 = vector.load %arg1[%c0, %c0_0, %c0_1] : memref<8x32x64xf32, #tpu.memory_space<vmem>>, vector<8x32x64xf32>
    %1 = vector.shape_cast %0 : vector<8x32x64xf32> to vector<256x64xf32>
    %c0_2 = arith.constant 0 : index
    %c0_3 = arith.constant 0 : index
    %2 = vector.load %arg2[%c0_2, %c0_3] : memref<64x96xf32, #tpu.memory_space<vmem>>, vector<64x96xf32>
    %cst = arith.constant dense<0.000000e+00> : vector<256x96xf32>
    %3 = tpu.matmul %1, %2, %cst {dimension_numbers = #tpu.dot_dimension_numbers<[1], [0], [0], [1], [0, 0, 1, 1], [], []>} : vector<256x64xf32>, vector<64x96xf32>, vector<256x96xf32> -> vector<256x96xf32>
    %4 = vector.shape_cast %3 : vector<256x96xf32> to vector<8x32x96xf32>
    %5 = vector.extract_strided_slice %4 {offsets = [0, 0, 0], sizes = [8, 32, 32], strides = [1, 1, 1]} : vector<8x32x96xf32> to vector<8x32x32xf32>
    %6 = vector.extract_strided_slice %4 {offsets = [0, 0, 32], sizes = [8, 32, 32], strides = [1, 1, 1]} : vector<8x32x96xf32> to vector<8x32x32xf32>
    %7 = vector.extract_strided_slice %4 {offsets = [0, 0, 64], sizes = [8, 32, 32], strides = [1, 1, 1]} : vector<8x32x96xf32> to vector<8x32x32xf32>
    "tpu.trace_start"() <{level = 10 : i32, message = "bqd,bkd->bqk"}> : () -> ()
    %cst_4 = arith.constant dense<0.000000e+00> : vector<8x32x32xf32>
    %8 = tpu.matmul %5, %6, %cst_4 {dimension_numbers = #tpu.dot_dimension_numbers<[2], [2], [1], [1], [0, 0, 0, 1, 1, 1], [0], [0]>} : vector<8x32x32xf32>, vector<8x32x32xf32>, vector<8x32x32xf32> -> vector<8x32x32xf32>
    "tpu.trace_stop"() : () -> ()
    %cst_5 = arith.constant 1.250000e-01 : f32
    %9 = vector.broadcast %cst_5 : f32 to vector<8x32x32xf32>
    %10 = arith.mulf %8, %9 : vector<8x32x32xf32>
    %11 = tpu.iota {dimensions = array<i32: 0>} : vector<32x32xi32>
    %12 = tpu.iota {dimensions = array<i32: 1>} : vector<32x32xi32>
    %13 = arith.cmpi sle, %12, %11 : vector<32x32xi32>
    %14 = vector.shape_cast %13 : vector<32x32xi1> to vector<1x32x32xi1>
    %cst_6 = arith.constant 0xFF800000 : f32
    %15 = vector.shape_cast %14 : vector<1x32x32xi1> to vector<1x32x32xi1>
    %16 = vector.broadcast %15 : vector<1x32x32xi1> to vector<8x32x32xi1>
    %17 = vector.broadcast %cst_6 : f32 to vector<8x32x32xf32>
    %18 = arith.select %16, %10, %17 : vector<8x32x32xi1>, vector<8x32x32xf32>
    %cst_7 = arith.constant dense<0xFF800000> : vector<8x32xf32>
    %19 = vector.multi_reduction <maximumf>, %18, %cst_7 [2] : vector<8x32x32xf32> to vector<8x32xf32>
    %20 = vector.shape_cast %19 : vector<8x32xf32> to vector<8x32x1xf32>
    %21 = vector.broadcast %20 : vector<8x32x1xf32> to vector<8x32x32xf32>
    %22 = arith.subf %18, %21 : vector<8x32x32xf32>
    %23 = math.exp %22 : vector<8x32x32xf32>
    %cst_8 = arith.constant dense<0.000000e+00> : vector<8x32xf32>
    %24 = vector.multi_reduction <add>, %23, %cst_8 [2] : vector<8x32x32xf32> to vector<8x32xf32>
    %25 = vector.shape_cast %24 : vector<8x32xf32> to vector<8x32x1xf32>
    %26 = tpu.reciprocal %25 {approx = true} : vector<8x32x1xf32> -> vector<8x32x1xf32>
    %27 = vector.broadcast %26 : vector<8x32x1xf32> to vector<8x32x32xf32>
    %28 = arith.mulf %23, %27 : vector<8x32x32xf32>
    "tpu.trace_start"() <{level = 10 : i32, message = "bqk,bkd->bqd"}> : () -> ()
    %cst_9 = arith.constant dense<0.000000e+00> : vector<8x32x32xf32>
    %29 = tpu.matmul %28, %7, %cst_9 {dimension_numbers = #tpu.dot_dimension_numbers<[2], [1], [1], [2], [0, 0, 0, 1, 1, 2], [0], [0]>} : vector<8x32x32xf32>, vector<8x32x32xf32>, vector<8x32x32xf32> -> vector<8x32x32xf32>
    "tpu.trace_stop"() : () -> ()
    %30 = vector.shape_cast %29 : vector<8x32x32xf32> to vector<8x1024xf32>
    %c0_10 = arith.constant 0 : index
    %c0_11 = arith.constant 0 : index
    %31 = vector.load %arg3[%c0_10, %c0_11] : memref<8x1024xf32, #tpu.memory_space<vmem>>, vector<8x1024xf32>
    tpu.vector_store %arg3[%c0_10, %c0_11], %30 {strides = array<i32>} : memref<8x1024xf32, #tpu.memory_space<vmem>>, vector<8x1024xf32>,
    return
  }
  func.func @transform_0(%arg0: i32) -> (i32, i32, i32) {
    %c0_i32 = arith.constant 0 : i32
    %c0_i32_0 = arith.constant 0 : i32
    %c0_i32_1 = arith.constant 0 : i32
    return %arg0, %c0_i32, %c0_i32_0 : i32, i32, i32
  }
  func.func @transform_1(%arg0: i32) -> (i32, i32) {
    %c0_i32 = arith.constant 0 : i32
    %c0_i32_0 = arith.constant 0 : i32
    %c0_i32_1 = arith.constant 0 : i32
    return %c0_i32, %c0_i32_0 : i32, i32
  }
  func.func @transform_2(%arg0: i32) -> (i32, i32) {
    %c0_i32 = arith.constant 0 : i32
    %c0_i32_0 = arith.constant 0 : i32
    return %arg0, %c0_i32 : i32, i32
  }
}

</mosaic_0001>

<bundles_post_ra>
// kernel: tpu_custom_call.1
= control target key start
LH: loop header
LB: loop body
LE: loop exit
PB: predicated region body
PF: predicated region fallthrough
CT: control target
= control target key end

     0   :  { %7 = vsyncpa [#allocation3], 0  ;;  %s5908_s0 = inlined_call_operand.hbm [shape: f32[16,32,64], index: 0, kind: input, shape index: {}]   ;;  %s5909_s1 = inlined_call_operand.hbm [shape: f32[64,96], index: 1, kind: input, shape index: {}]   ;;  %s5910_s2 = inlined_call_operand.hbm [shape: f32[16,1024], index: 2, kind: output, shape index: {}]  }
   0x1   :  { %9 = vsyncpa [#allocation3 + $0x1], 0 }
   0x2   :  { %10 = vsyncpa [#allocation6], 0 }
   0x3   :  { %11 = vsyncpa [#allocation4], 0 }
   0x4   :  { %13 = vsyncpa [#allocation4 + $0x1], 0  ;;  %s4466_s9 = smov 0   ;;  %s4468_s10 = smov 0  }
   0x5   :  { %s4470_s11 = smov 0   ;;  %s4472_s12 = smov 0  }
   0x6 LB: > { %s4487_s13 = sadd.s32 4294967295, %s4439_s12   ;;  %s3521_s14 = sadd.s32 4294967294, %s4439_s12   ;;  %s4439_s12 = sphi %s4472_s12, %s5953_s12   ;;  %s4435_s11 = sphi %s4470_s11, %s5952_s11   ;;  %s4431_s10 = sphi %s4468_s10, %s5951_s10   ;;  %s4427_s9 = sphi %s4466_s9, %s5950_s9  }
   0x7   : > { %p39_p0 = scmp.ne.s32.totalorder %s4431_s10, %s4427_s9  ;;  %p5911_p1 = scmp.eq.s32.totalorder %s4487_s13, 0 }
   0x8   : > { %p90_p3 = scmp.eq.s32.totalorder %s3521_s14, 1  ;;  %p3522_p5 = scmp.ge.s32.totalorder %s4439_s12, 1 }
   0x9   : > { %p4496_p4 = por %p5911_p1, %p39_p0  ;;  %p97_p7 = scmp.lt.s32.totalorder %s4439_s12, 3 }
   0xa   : > { %p4501_p6 = por %p90_p3, %p39_p0  ;;  %s4441_s18 = smov [#allocation5]  }
   0xb   : > { %s5920_s15 = scalar_select %p4496_p4, 1, 0 }
   0xc   : > { %s5921_s16 = scalar_select %p4501_p6, 1, 0 }
   0xd   : > { %p4506_p8 = pnand %p3522_p5, %p97_p7  ;;  %s109_s19 = sshll.u32 %s4441_s18, 4  ;;  %s110_s19 = int_to_ptr.vmem [resolvable:$true] %s109_s19 }
   0xe   : > { %s4520_s21 = sadd.s32 1, %s4439_s12   ;;  %s26_s22 = sadd.s32 1, %s4435_s11 }
   0xf   : > { %s5922_s17 = scalar_select %p4506_p8, 1, 0 }
  0x10   : > { %p4133_p9 = pneg %p4506_p8  ;;  %s23_s23 = ssub.s32 %s4439_s12, %s4520_s21 }
  0x11   : > { %s4328_s24 = scalar_lea.vmem %s110_s19, 1024  ;;  %p4336_p5 = scmp.lt.s32.totalorder %s110_s19, %s110_s19 }
  0x12   : > { %p4515_p11 = pnand %p4133_p9, %p5911_p1  ;;  %p4329_p13 = scmp.ne.s32.totalorder %s110_s19, %s4328_s24 }
  0x13   : > { %p4337_p7 = scmp.lt.s32.totalorder %s4328_s24, %s4328_s24 }
  0x14   : > { %p4319_p12 = pneg %p4515_p11 }
  0x15   : > { %p4338_p10 = por %p4337_p7, %p4336_p5 }
  0x16   : > { %p4331_p0 = pnand %p4329_p13, %p4319_p12 }
  0x18   : > { %p4332_p3 = pneg %p4331_p0 }
  0x1a   : > { %p4339_p2 = pnand %p4338_p10, %p4332_p3 }
  0x1c   : > { %4342 = shalt.err (!%p4339_p2)
}
  0x1d   : > { %s4442_s25 = smov 128   ;;  %s4443_s26 = smov 8  }
  0x1e   : > { %4136 = dma.hbm_to_vmem [thread:$0]  (!%p4515_p11), %s5909_s1, 1024, %s110_s19, [#allocation6], %s4442_s25, %s4442_s25, %s4443_s26  }
  0x1f   : > { %p24_p2 = scmp.eq.s32.totalorder %s23_s23, 0  ;;  %p33_p9 = scmp.ne.s32.totalorder %s4435_s11, %s4431_s10 }
  0x20   : > { %p34_p10 = scmp.eq.s32.totalorder %s4439_s12, 0  ;;  %p4146_p12 = scmp.lt.s32.totalorder %s4439_s12, 2 }
  0x21   : > { %s4540_s29 = scalar_select %p24_p2, %s4435_s11, %s26_s22  }
  0x22   : > { %p35_p13 = por %p34_p10, %p33_p9  ;;  %p5924_p0 = scmp.eq.s32.totalorder %s4487_s13, 1 }
  0x23   : > { %s123_s3 = sand.u32 1, %s4435_s11   ;;  %s3667_s4 = sshll.u32 %s4439_s12, 12 }
  0x24   : > { %p4544_p3 = por %p5924_p0, %p33_p9  ;;  %s3525_s5 = sshll.u32 %s123_s3, 8 }
  0x25   : > { %s4553_s8 = scalar_lea.hbm %s5908_s0, %s3667_s4  ;;  %s127_s14 = scalar_lea.vmem [#allocation2], %s3525_s5 }
  0x26   : > { %s5925_s30 = scalar_select %p4544_p3, 1, 0 }
  0x27   : > { %s135_s18 = sshll.u32 %s127_s14, 4  ;;  %p4555_p11 = pnand %p4146_p12, %p35_p13  ;;  %s4559_s18 = int_to_ptr.vmem [resolvable:$true] %s135_s18 }
  0x28   : > { %s4561_s20 = scalar_lea.sflag [#allocation3], %s123_s3  ;;  %s4343_s22 = scalar_lea.hbm %s4553_s8, 4096 }
  0x29   : > { %p4344_p5 = scmp.ne.s32.totalorder %s4553_s8, %s4343_s22  ;;  %p4345_p7 = pneg %p4555_p11 }
  0x2a   : > { %s4348_s27 = scalar_lea.hbm %s5908_s0, 8192  ;;  %p4349_p10 = scmp.lt.s32.totalorder %s4553_s8, %s5908_s0 }
  0x2b   : > { %p4346_p2 = pnand %p4345_p7, %p4344_p5  ;;  %p4350_p12 = scmp.lt.s32.totalorder %s4348_s27, %s4343_s22 }
  0x2d   : > { %p4347_p9 = pneg %p4346_p2  ;;  %p4351_p13 = por %p4350_p12, %p4349_p10 }
  0x2f   : > { %p4352_p0 = pnand %p4351_p13, %p4347_p9 }
  0x31   : > { %4355 = shalt.err (!%p4352_p0)
}
  0x32   : > { %s4356_s3 = scalar_lea.vmem %s4559_s18, 4096  ;;  %s4444_s5 = smov [#allocation2]  }
  0x33   : > { %p4357_p1 = scmp.ne.s32.totalorder %s4559_s18, %s4356_s3  ;;  %s4361_s6 = sshll.u32 %s4444_s5, 4  ;;  %s4362_s6 = int_to_ptr.vmem [resolvable:$false] %s4361_s6 }
  0x34   : > { %s4363_s7 = scalar_lea.vmem %s4362_s6, 8192  ;;  %p4364_p2 = scmp.lt.s32.totalorder %s4559_s18, %s4362_s6 }
  0x35   : > { %p4359_p6 = pnand %p4357_p1, %p4345_p7  ;;  %p4365_p3 = scmp.lt.s32.totalorder %s4363_s7, %s4356_s3 }
  0x37   : > { %p4360_p5 = pneg %p4359_p6  ;;  %p4366_p4 = por %p4365_p3, %p4364_p2 }
  0x39   : > { %p4367_p8 = pnand %p4366_p4, %p4360_p5 }
  0x3b   : > { %4370 = shalt.err (!%p4367_p8)
}
  0x3c   : > { %4140 = dma.hbm_to_vmem [thread:$0]  (!%p4555_p11), %s4553_s8, 4096, %s4559_s18, %s4561_s20, %s4442_s25, %s4442_s25, %s4443_s26  }
  0x3d   : > { %p5927_p1 = scmp.ne.s32.totalorder %s5922_s17, 0 }
  0x3f   : > { %147 = sbr.rel (%p5927_p1) target bundleno = 1414 (0x586), region = 28 }
  0x44   : > { %s4588_s14 = sand.u32 1, %s4431_s10   ;;  %p5928_p4 = scmp.ne.s32.totalorder %s5920_s15, 0 }
  0x45   : > { %s3530_s22 = sshll.u32 %s4588_s14, 8  ;;  %s150_s23 = scalar_lea.sflag [#allocation3], %s4588_s14 }
  0x46   : > { %s4592_s24 = scalar_lea.vmem [#allocation2], %s3530_s22 }
  0x47   : > { %4414 = dma.done.wait (%p5928_p4), %s150_s23, 4096  }
  0x48   : > { %4416 = vsyncadd (%p5928_p4), %s150_s23, 4294963200  ;;  %p5929_p6 = scmp.eq.s32.totalorder %s4487_s13, 0 }
  0x4a   : > { %4418 = dma.done.wait (%p5929_p6), [#allocation6], 1024   ;;  %p5930_p8 = pmov %p5929_p6 }
  0x4b   : > { %v218_v0 = vld [vmem:[#allocation5 + $0x38] sm:$0xff]  ;;  %v217_v1 = vld [vmem:[#allocation5 + $0x30] sm:$0xff]  ;;  %vm219_vm0 = vcmask 523264   ;;  %v216_v2 = vld [vmem:[#allocation5 + $0x28] sm:$0xff]  ;;  %vm553_vm1 = vcmask 261120   ;;  %s4445_s15 = smov 96  }
  0x4c   : > { %4420 = vsyncadd (%p5930_p8), [#allocation6], 4294966272  ;;  %3837 = vmatprep.subr.mxu0 %v218_v0  ;;  %v179_v3 = vld [vmem:[%s4592_s24] sm:$0xff]  ;;  %v214_v5 = vld [vmem:[#allocation5 + $0x18] sm:$0xff]  ;;  %s4446_s17 = smov 64   ;;  %s4449_s25 = smov 32  }
  0x4d   : > { %3838 = vmatpush3.msra.mxu0 %v218_v0  ;;  %3853 = vmatprep.mubr.msk.f32.mxu0 %vm219_vm0, %v179_v3  ;;  %v215_v4 = vld [vmem:[#allocation5 + $0x20] sm:$0xff]  ;;  %v213_v6 = vld [vmem:[#allocation5 + $0x10] sm:$0xff]  ;;  %v212_v7 = vld [vmem:[#allocation5 + $0x8] sm:$0xff]  ;;  %s3532_s26 = sshll.u32 %s4588_s14, 6  ;;  %vm3395_vm6 = vcmask 785408   ;;  %s3668_s18 = sshll.u32 %s4487_s13, 10 }
  0x4e   : > { %3839 = vmatprep.subr.mxu0 %v217_v1  ;;  %v211_v8 = vld [vmem:[#allocation5] sm:$0xff]  ;;  %v180_v9 = vld [vmem:[%s4592_s24 + $0x8] sm:$0xff]  ;;  %v181_v10 = vld [vmem:[%s4592_s24 + $0x10] sm:$0xff]  ;;  %s5813_s8 = scalar_lea.vmem [#allocation7], %s3532_s26  ;;  %s5862_s27 = scalar_lea.hbm %s5910_s2, %s3668_s18 }
  0x4f   : > { %3840 = vmatpush3.msra.mxu0 %v217_v1  ;;  %v182_v11 = vld [vmem:[%s4592_s24 + $0x18] sm:$0xff]  ;;  %v183_v12 = vld [vmem:[%s4592_s24 + $0x20] sm:$0xff]  ;;  %v184_v13 = vld [vmem:[%s4592_s24 + $0x28] sm:$0xff]  ;;  %s3441_s19 = sshll.u32 %s5813_s8, 4  ;;  %s3427_s28 = scalar_lea.sflag [#allocation4], %s4588_s14  ;;  %s5864_s19 = int_to_ptr.vmem [resolvable:$true] %s3441_s19 }
  0x50   : > { %3841 = vmatprep.subr.mxu0 %v216_v2  ;;  %v185_v14 = vld [vmem:[%s4592_s24 + $0x30] sm:$0xff]  ;;  %v186_v15 = vld [vmem:[%s4592_s24 + $0x38] sm:$0xff]  ;;  %v187_v16 = vld [vmem:[%s4592_s24 + $0x40] sm:$0xff]  ;;  %s4371_s4 = scalar_lea.vmem %s5864_s19, 1024  ;;  %p5947_p11 = scmp.ne.s32.totalorder %s5925_s30, 0 }
  0x51   : > { %3842 = vmatpush3.msra.mxu0 %v216_v2  ;;  %v188_v17 = vld [vmem:[%s4592_s24 + $0x48] sm:$0xff]  ;;  %v189_v18 = vld [vmem:[%s4592_s24 + $0x50] sm:$0xff]  ;;  %v190_v19 = vld [vmem:[%s4592_s24 + $0x58] sm:$0xff]  ;;  %p4372_p3 = scmp.ne.s32.totalorder %s5864_s19, %s4371_s4  ;;  %s4450_s3 = smov [#allocation7]  }
  0x52   : > { %3843 = vmatprep.subr.mxu0 %v215_v4  ;;  %v191_v20 = vld [vmem:[%s4592_s24 + $0x60] sm:$0xff]  ;;  %v192_v21 = vld [vmem:[%s4592_s24 + $0x68] sm:$0xff]  ;;  %v193_v22 = vld [vmem:[%s4592_s24 + $0x70] sm:$0xff]  ;;  %s4375_s5 = sshll.u32 %s4450_s3, 4  ;;  %s4376_s5 = int_to_ptr.vmem [resolvable:$false] %s4375_s5 }
  0x53   : > { %3844 = vmatpush3.msra.mxu0 %v215_v4  ;;  %v194_v23 = vld [vmem:[%s4592_s24 + $0x78] sm:$0xff]  ;;  %v195_v24 = vld [vmem:[%s4592_s24 + $0x80] sm:$0xff]  ;;  %v196_v25 = vld [vmem:[%s4592_s24 + $0x88] sm:$0xff]  ;;  %p4373_p7 = pnand %p4372_p3, %p5947_p11  ;;  %s4377_s6 = scalar_lea.vmem %s4376_s5, 2048 }
  0x54   : > { %3845 = vmatprep.subr.mxu0 %v214_v5  ;;  %v197_v26 = vld [vmem:[%s4592_s24 + $0x90] sm:$0xff]  ;;  %v198_v27 = vld [vmem:[%s4592_s24 + $0x98] sm:$0xff]  ;;  %v199_v28 = vld [vmem:[%s4592_s24 + $0xa0] sm:$0xff]  ;;  %p4378_p10 = scmp.lt.s32.totalorder %s5864_s19, %s4376_s5  ;;  %p4379_p12 = scmp.lt.s32.totalorder %s4377_s6, %s4371_s4 }
  0x55   : > { %3846 = vmatpush3.msra.mxu0 %v214_v5  ;;  %v200_v29 = vld [vmem:[%s4592_s24 + $0xa8] sm:$0xff]  ;;  %v201_v30 = vld [vmem:[%s4592_s24 + $0xb0] sm:$0xff]  ;;  %v202_v31 = vld [vmem:[%s4592_s24 + $0xb8] sm:$0xff]  ;;  %p4374_p9 = pneg %p4373_p7 }
  0x56   : > { %3847 = vmatprep.subr.mxu0 %v213_v6  ;;  %v203_v32 = vld [vmem:[%s4592_s24 + $0xc0] sm:$0xff]  ;;  %v204_v33 = vld [vmem:[%s4592_s24 + $0xc8] sm:$0xff]  ;;  %v205_v34 = vld [vmem:[%s4592_s24 + $0xd0] sm:$0xff]  ;;  %p4380_p13 = por %p4379_p12, %p4378_p10 }
  0x57   : > { %3848 = vmatpush3.msra.mxu0 %v213_v6  ;;  %v206_v35 = vld [vmem:[%s4592_s24 + $0xd8] sm:$0xff]  ;;  %v207_v36 = vld [vmem:[%s4592_s24 + $0xe0] sm:$0xff]  ;;  %v208_v37 = vld [vmem:[%s4592_s24 + $0xe8] sm:$0xff] }
  0x58   : > { %3849 = vmatprep.subr.mxu0 %v212_v7  ;;  %v209_v38 = vld [vmem:[%s4592_s24 + $0xf0] sm:$0xff]  ;;  %v210_v39 = vld [vmem:[%s4592_s24 + $0xf8] sm:$0xff]  ;;  %p4381_p0 = pnand %p4380_p13, %p4374_p9 }
  0x59   : > { %3850 = vmatpush3.msra.mxu0 %v212_v7 }
  0x5a   : > { %3851 = vmatprep.subr.mxu0 %v211_v8 }
  0x5b   : > { %3852 = vmatpush3.msra.mxu0 %v211_v8 }
  0x5c   : > { %3854 = vmatmul.mubr.msk.f32.vlgmr.msra.gmra.mxu0 %vm219_vm0, %v180_v9 }
  0x5d   : > { %3856 = vmatprep.mubr.msk.f32.mxu0 %vm219_vm0, %v181_v10 }
  0x60   : > { %3857 = vmatmul.mubr.msk.f32.gmra.mxu0 %vm219_vm0, %v182_v11 }
  0x61   : > { %3859 = vmatprep.mubr.msk.f32.mxu0 %vm219_vm0, %v183_v12 }
  0x64   : > { %3860 = vmatmul.mubr.msk.f32.gmra.mxu0 %vm219_vm0, %v184_v13 }
  0x65   : > { %3862 = vmatprep.mubr.msk.f32.mxu0 %vm219_vm0, %v185_v14 }
  0x68   : > { %3863 = vmatmul.mubr.msk.f32.gmra.mxu0 %vm219_vm0, %v186_v15 }
  0x69   : > { %3865 = vmatprep.mubr.msk.f32.mxu0 %vm219_vm0, %v187_v16 }
  0x6c   : > { %3866 = vmatmul.mubr.msk.f32.gmra.mxu0 %vm219_vm0, %v188_v17 }
  0x6d   : > { %3868 = vmatprep.mubr.msk.f32.mxu0 %vm219_vm0, %v189_v18 }
  0x70   : > { %3869 = vmatmul.mubr.msk.f32.gmra.mxu0 %vm219_vm0, %v190_v19 }
  0x71   : > { %3871 = vmatprep.mubr.msk.f32.mxu0 %vm219_vm0, %v191_v20 }
  0x74   : > { %3872 = vmatmul.mubr.msk.f32.gmra.mxu0 %vm219_vm0, %v192_v21 }
  0x75   : > { %3874 = vmatprep.mubr.msk.f32.mxu0 %vm219_vm0, %v193_v22 }
  0x78   : > { %3875 = vmatmul.mubr.msk.f32.gmra.mxu0 %vm219_vm0, %v194_v23 }
  0x79   : > { %3877 = vmatprep.mubr.msk.f32.mxu0 %vm219_vm0, %v195_v24 }
  0x7c   : > { %3878 = vmatmul.mubr.msk.f32.gmra.mxu0 %vm219_vm0, %v196_v25 }
  0x7d   : > { %3880 = vmatprep.mubr.msk.f32.mxu0 %vm219_vm0, %v197_v26 }
  0x80   : > { %3881 = vmatmul.mubr.msk.f32.gmra.mxu0 %vm219_vm0, %v198_v27 }
  0x81   : > { %3883 = vmatprep.mubr.msk.f32.mxu0 %vm219_vm0, %v199_v28 }
  0x84   : > { %3884 = vmatmul.mubr.msk.f32.gmra.mxu0 %vm219_vm0, %v200_v29 }
  0x85   : > { %3886 = vmatprep.mubr.msk.f32.mxu0 %vm219_vm0, %v201_v30 }
  0x88   : > { %3887 = vmatmul.mubr.msk.f32.gmra.mxu0 %vm219_vm0, %v202_v31 }
  0x89   : > { %3889 = vmatprep.mubr.msk.f32.mxu0 %vm219_vm0, %v203_v32 }
  0x8c   : > { %3890 = vmatmul.mubr.msk.f32.gmra.mxu0 %vm219_vm0, %v204_v33 }
  0x8d   : > { %3892 = vmatprep.mubr.msk.f32.mxu0 %vm219_vm0, %v205_v34 }
  0x90   : > { %3893 = vmatmul.mubr.msk.f32.gmra.mxu0 %vm219_vm0, %v206_v35 }
  0x91   : > { %3895 = vmatprep.mubr.msk.f32.mxu0 %vm219_vm0, %v207_v36 }
  0x94   : > { %3896 = vmatmul.mubr.msk.f32.gmra.mxu0 %vm219_vm0, %v208_v37 }
  0x95   : > { %3898 = vmatprep.mubr.msk.f32.mxu0 %vm219_vm0, %v209_v38 }
  0x98   : > { %3899 = vmatmul.mubr.msk.f32.gmra.mxu0 %vm219_vm0, %v210_v39 }
 0x11c   : > { %v4666_v40 = vpop.f32.mrf.mxu0 }
 0x11d   : > { %547 = vrot.lane.b32.xlu1 %v4666_v40, %s4445_s15 }
 0x11e   : > { %v4670_v41 = vpop.f32.mrf.mxu0 }
 0x11f   : > { %3909 = vmatprep.mubr.msk.f32.mxu1 %vm553_vm1, %v4670_v41 }
 0x120   : > { %v4674_v42 = vpop.f32.mrf.mxu0 }
 0x121   : > { %545 = vrot.lane.b32.xlu1 %v4670_v41, %s4445_s15  ;;  %551 = vrot.lane.b32.xlu0 %v4674_v42, %s4445_s15 }
 0x122   : > { %v4680_v43 = vpop.f32.mrf.mxu0 }
 0x124   : > { %v4682_v44 = vpop.f32.mrf.mxu0 }
 0x125   : > { %549 = vrot.lane.b32.xlu0 %v4680_v43, %s4445_s15 }
 0x126   : > { %v4686_v45 = vpop.f32.mrf.mxu0 }
 0x128   : > { %v4688_v46 = vpop.f32.mrf.mxu0 }
 0x129   : > { %665 = vrot.lane.b32.xlu0 %v4688_v46, %s4445_s15 }
 0x12a   : > { %v4692_v47 = vpop.f32.mrf.mxu0 }
 0x12b   : > { %663 = vrot.lane.b32.xlu1 %v4692_v47, %s4445_s15 }
 0x12c   : > { %v4696_v48 = vpop.f32.mrf.mxu0 }
 0x12d   : > { %661 = vrot.lane.b32.xlu0 %v4682_v44, %s4445_s15 }
 0x12e   : > { %v4700_v49 = vpop.f32.mrf.mxu0 }
 0x12f   : > { %659 = vrot.lane.b32.xlu1 %v4686_v45, %s4445_s15 }
 0x130   : > { %v4704_v50 = vpop.f32.mrf.mxu0 }
 0x131   : > { %778 = vrot.lane.b32.xlu0 %v4704_v50, %s4445_s15 }
 0x132   : > { %v4708_v51 = vpop.f32.mrf.mxu0 }
 0x133   : > { %776 = vrot.lane.b32.xlu1 %v4708_v51, %s4445_s15 }
 0x134   : > { %v4712_v52 = vpop.f32.mrf.mxu0 }
 0x135   : > { %774 = vrot.lane.b32.xlu0 %v4696_v48, %s4445_s15 }
 0x136   : > { %v4716_v53 = vpop.f32.mrf.mxu0 }
 0x137   : > { %772 = vrot.lane.b32.xlu1 %v4700_v49, %s4445_s15 }
 0x138   : > { %v4720_v54 = vpop.f32.mrf.mxu0 }
 0x139   : > { %891 = vrot.lane.b32.xlu0 %v4720_v54, %s4445_s15 }
 0x13a   : > { %v4724_v55 = vpop.f32.mrf.mxu0 }
 0x13b   : > { %889 = vrot.lane.b32.xlu1 %v4724_v55, %s4445_s15 }
 0x13c   : > { %v4728_v56 = vpop.f32.mrf.mxu0 }
 0x13d   : > { %887 = vrot.lane.b32.xlu0 %v4712_v52, %s4445_s15 }
 0x13e   : > { %v462_v57 = vpop.f32.mrf.mxu0 }
 0x13f   : > { %885 = vrot.lane.b32.xlu1 %v4716_v53, %s4445_s15  ;;  %3965 = vmatprep.mubr.msk.f32.mxu0 %vm553_vm1, %v462_v57 }
 0x140   : > { %v4735_v58 = vpop.f32.mrf.mxu0 }
 0x141   : > { %1004 = vrot.lane.b32.xlu0 %v4735_v58, %s4445_s15 }
 0x142   : > { %v4739_v59 = vpop.f32.mrf.mxu0 }
 0x144   : > { %v4741_v60 = vpop.f32.mrf.mxu0 }
 0x145   : > { %1002 = vrot.lane.b32.xlu0 %v4739_v59, %s4445_s15 }
 0x146   : > { %v4745_v61 = vpop.f32.mrf.mxu0 }
 0x148   : > { %v4747_v62 = vpop.f32.mrf.mxu0 }
 0x149   : > { %1000 = vrot.lane.b32.xlu0 %v4728_v56, %s4445_s15  ;;  %1117 = vrot.lane.b32.xlu1 %v4747_v62, %s4445_s15 }
 0x14a   : > { %v4753_v63 = vpop.f32.mrf.mxu0 }
 0x14c   : > { %v4755_v0 = vpop.f32.mrf.mxu0 }
 0x14d   : > { %998 = vrot.lane.b32.xlu0 %v462_v57, %s4445_s15  ;;  %1115 = vrot.lane.b32.xlu1 %v4753_v63, %s4445_s15 }
 0x14e   : > { %v4760_v1 = vpop.f32.mrf.mxu0 }
 0x150   : > { %v4762_v2 = vpop.f32.mrf.mxu0 }
 0x151   : > { %1113 = vrot.lane.b32.xlu1 %v4741_v60, %s4445_s15  ;;  %1230 = vrot.lane.b32.xlu0 %v4762_v2, %s4445_s15 }
 0x152   : > { %v4768_v3 = vpop.f32.mrf.mxu0 }
 0x154   : > { %v4770_v4 = vpop.f32.mrf.mxu0 }
 0x155   : > { %1111 = vrot.lane.b32.xlu1 %v4745_v61, %s4445_s15  ;;  %1228 = vrot.lane.b32.xlu0 %v4768_v3, %s4445_s15 }
 0x156   : > { %v4776_v5 = vpop.f32.mrf.mxu0 }
 0x158   : > { %v4778_v6 = vpop.f32.mrf.mxu0 }
 0x159   : > { %1226 = vrot.lane.b32.xlu0 %v4755_v0, %s4445_s15  ;;  %1343 = vrot.lane.b32.xlu1 %v4778_v6, %s4445_s15 }
 0x15a   : > { %v4784_v7 = vpop.f32.mrf.mxu0 }
 0x15d   : > { %1224 = vrot.lane.b32.xlu0 %v4760_v1, %s4445_s15  ;;  %1341 = vrot.lane.b32.xlu1 %v4784_v7, %s4445_s15 }
 0x161   : > { %1996 = vrot.lane.b32.xlu0 %v4688_v46, %s4446_s17  ;;  %1339 = vrot.lane.b32.xlu1 %v4770_v4, %s4445_s15 }
 0x165   : > { %1992 = vrot.lane.b32.xlu0 %v4682_v44, %s4446_s17  ;;  %1337 = vrot.lane.b32.xlu1 %v4776_v5, %s4445_s15 }
 0x169   : > { %2214 = vrot.lane.b32.xlu0 %v4720_v54, %s4446_s17  ;;  %1887 = vrot.lane.b32.xlu1 %v4674_v42, %s4446_s17 }
 0x16d   : > { %2101 = vrot.lane.b32.xlu0 %v4696_v48, %s4446_s17  ;;  %1885 = vrot.lane.b32.xlu1 %v4680_v43, %s4446_s17 }
 0x171   : > { %2099 = vrot.lane.b32.xlu0 %v4700_v49, %s4446_s17  ;;  %1994 = vrot.lane.b32.xlu1 %v4692_v47, %s4446_s17 }
 0x175   : > { %2323 = vrot.lane.b32.xlu0 %v4735_v58, %s4446_s17  ;;  %1883 = vrot.lane.b32.xlu1 %v4666_v40, %s4446_s17 }
 0x179   : > { %2321 = vrot.lane.b32.xlu0 %v4739_v59, %s4446_s17  ;;  %1881 = vrot.lane.b32.xlu1 %v4670_v41, %s4446_s17 }
 0x17d   : > { %2319 = vrot.lane.b32.xlu0 %v4728_v56, %s4446_s17  ;;  %1990 = vrot.lane.b32.xlu1 %v4686_v45, %s4446_s17 }
 0x181   : > { %2317 = vrot.lane.b32.xlu0 %v462_v57, %s4446_s17  ;;  %2105 = vrot.lane.b32.xlu1 %v4704_v50, %s4446_s17 }
 0x185   : > { %2103 = vrot.lane.b32.xlu1 %v4708_v51, %s4446_s17  ;;  %2541 = vrot.lane.b32.xlu0 %v4762_v2, %s4446_s17 }
 0x189   : > { %2212 = vrot.lane.b32.xlu1 %v4724_v55, %s4446_s17  ;;  %2539 = vrot.lane.b32.xlu0 %v4768_v3, %s4446_s17 }
 0x18d   : > { %2210 = vrot.lane.b32.xlu1 %v4712_v52, %s4446_s17 }
 0x18f   : > { %v548_v8 = vpop.permute.xlu1 %547 }
 0x191   : > { %2208 = vrot.lane.b32.xlu1 %v4716_v53, %s4446_s17 }
 0x193   : > { %v552_v9 = vpop.permute.xlu0 %551  ;;  %v546_v11 = vpop.permute.xlu1 %545 }
 0x194   : > { %3901 = vmatprep.subr.msk.mxu1 %vm553_vm1, %v552_v9 }
 0x195   : > { %3902 = vmatpush3.xpose.msk.msra.mxu1 %vm553_vm1, %v552_v9  ;;  %2432 = vrot.lane.b32.xlu1 %v4747_v62, %s4446_s17 }
 0x197   : > { %v550_v10 = vpop.permute.xlu0 %549 }
 0x198   : > { %3903 = vmatprep.subr.msk.mxu1 %vm553_vm1, %v550_v10 }
 0x199   : > { %3904 = vmatpush3.xpose.msk.msra.mxu1 %vm553_vm1, %v550_v10  ;;  %2430 = vrot.lane.b32.xlu1 %v4753_v63, %s4446_s17 }
 0x19a   : > { %3905 = vmatprep.subr.msk.mxu1 %vm553_vm1, %v548_v8 }
 0x19b   : > { %v666_v12 = vpop.permute.xlu0 %665 }
 0x19d   : > { %3906 = vmatpush3.xpose.msk.msra.mxu1 %vm553_vm1, %v548_v8  ;;  %v664_v13 = vpop.permute.xlu1 %663  ;;  %2428 = vrot.lane.b32.xlu1 %v4741_v60, %s4446_s17 }
 0x19e   : > { %3907 = vmatprep.subr.msk.mxu1 %vm553_vm1, %v546_v11 }
 0x19f   : > { %v662_v14 = vpop.permute.xlu0 %661 }
 0x1a1   : > { %3908 = vmatpush3.xpose.msk.msra.mxu1 %vm553_vm1, %v546_v11  ;;  %v660_v15 = vpop.permute.xlu1 %659  ;;  %2426 = vrot.lane.b32.xlu1 %v4745_v61, %s4446_s17 }
 0x1a2   : > { %3915 = vmatprep.subr.msk.mxu1 %vm553_vm1, %v666_v12 }
 0x1a3   : > { %v779_v16 = vpop.permute.xlu0 %778 }
 0x1a4   : > { %3910 = vmatmul.mubr.msk.f32.vlgmr.msra.gmra.mxu1 %vm553_vm1, %v4666_v40 }
 0x1a5   : > { %3912 = vmatprep.mubr.msk.f32.mxu1 %vm553_vm1, %v4680_v43  ;;  %3916 = vmatpush3.xpose.msk.msra.mxu1 %vm553_vm1, %v666_v12  ;;  %v777_v17 = vpop.permute.xlu1 %776 }
 0x1a6   : > { %3917 = vmatprep.subr.msk.mxu1 %vm553_vm1, %v664_v13  ;;  %2650 = vrot.lane.b32.xlu1 %v4778_v6, %s4446_s17 }
 0x1a7   : > { %v775_v18 = vpop.permute.xlu0 %774 }
 0x1a8   : > { %3913 = vmatmul.mubr.msk.f32.gmra.mxu1 %vm553_vm1, %v4674_v42 }
 0x1a9   : > { %3918 = vmatpush3.xpose.msk.msra.mxu1 %vm553_vm1, %v664_v13  ;;  %3923 = vmatprep.mubr.msk.f32.mxu1 %vm553_vm1, %v4686_v45  ;;  %v773_v19 = vpop.permute.xlu1 %772 }
 0x1aa   : > { %3919 = vmatprep.subr.msk.mxu1 %vm553_vm1, %v662_v14  ;;  %2648 = vrot.lane.b32.xlu1 %v4784_v7, %s4446_s17 }
 0x1ab   : > { %v892_v20 = vpop.permute.xlu0 %891 }
 0x1ad   : > { %3920 = vmatpush3.xpose.msk.msra.mxu1 %vm553_vm1, %v662_v14  ;;  %v890_v22 = vpop.permute.xlu1 %889 }
 0x1ae   : > { %3921 = vmatprep.subr.msk.mxu1 %vm553_vm1, %v660_v15 }
 0x1af   : > { %v888_v21 = vpop.permute.xlu0 %887 }
 0x1b1   : > { %3922 = vmatpush3.xpose.msk.msra.mxu1 %vm553_vm1, %v660_v15  ;;  %v886_v24 = vpop.permute.xlu1 %885 }
 0x1b2   : > { %3929 = vmatprep.subr.msk.mxu1 %vm553_vm1, %v779_v16 }
 0x1b3   : > { %v1005_v23 = vpop.permute.xlu0 %1004 }
 0x1b4   : > { %3924 = vmatmul.mubr.msk.f32.vlgmr.msra.gmra.mxu1 %vm553_vm1, %v4682_v44  ;;  %3957 = vmatprep.subr.msk.mxu0 %vm553_vm1, %v1005_v23 }
 0x1b5   : > { %3926 = vmatprep.mubr.msk.f32.mxu1 %vm553_vm1, %v4692_v47  ;;  %3930 = vmatpush3.xpose.msk.msra.mxu1 %vm553_vm1, %v779_v16 }
 0x1b6   : > { %3958 = vmatpush3.xpose.msk.msra.mxu0 %vm553_vm1, %v1005_v23  ;;  %3931 = vmatprep.subr.msk.mxu1 %vm553_vm1, %v777_v17 }
 0x1b7   : > { %v1003_v25 = vpop.permute.xlu0 %1002 }
 0x1b8   : > { %3927 = vmatmul.mubr.msk.f32.gmra.mxu1 %vm553_vm1, %v4688_v46  ;;  %3959 = vmatprep.subr.msk.mxu0 %vm553_vm1, %v1003_v25 }
 0x1b9   : > { %3932 = vmatpush3.xpose.msk.msra.mxu1 %vm553_vm1, %v777_v17  ;;  %3937 = vmatprep.mubr.msk.f32.mxu1 %vm553_vm1, %v4700_v49 }
 0x1ba   : > { %3960 = vmatpush3.xpose.msk.msra.mxu0 %vm553_vm1, %v1003_v25  ;;  %3933 = vmatprep.subr.msk.mxu1 %vm553_vm1, %v775_v18 }
 0x1bb   : > { %v1001_v26 = vpop.permute.xlu0 %1000  ;;  %v1118_v27 = vpop.permute.xlu1 %1117 }
 0x1bc   : > { %3961 = vmatprep.subr.msk.mxu0 %vm553_vm1, %v1001_v26 }
 0x1bd   : > { %3934 = vmatpush3.xpose.msk.msra.mxu1 %vm553_vm1, %v775_v18 }
 0x1be   : > { %3962 = vmatpush3.xpose.msk.msra.mxu0 %vm553_vm1, %v1001_v26  ;;  %3935 = vmatprep.subr.msk.mxu1 %vm553_vm1, %v773_v19 }
 0x1bf   : > { %v999_v28 = vpop.permute.xlu0 %998  ;;  %v1116_v29 = vpop.permute.xlu1 %1115 }
 0x1c0   : > { %3963 = vmatprep.subr.msk.mxu0 %vm553_vm1, %v999_v28 }
 0x1c1   : > { %3936 = vmatpush3.xpose.msk.msra.mxu1 %vm553_vm1, %v773_v19 }
 0x1c2   : > { %3964 = vmatpush3.xpose.msk.msra.mxu0 %vm553_vm1, %v999_v28  ;;  %3943 = vmatprep.subr.msk.mxu1 %vm553_vm1, %v892_v20 }
 0x1c3   : > { %v1114_v30 = vpop.permute.xlu1 %1113  ;;  %v1231_v31 = vpop.permute.xlu0 %1230 }
 0x1c4   : > { %3938 = vmatmul.mubr.msk.f32.vlgmr.msra.gmra.mxu1 %vm553_vm1, %v4696_v48  ;;  %3985 = vmatprep.subr.msk.mxu0 %vm553_vm1, %v1231_v31 }
 0x1c5   : > { %3966 = vmatmul.mubr.msk.f32.vlgmr.msra.gmra.mxu0 %vm553_vm1, %v4728_v56  ;;  %3940 = vmatprep.mubr.msk.f32.mxu1 %vm553_vm1, %v4708_v51 }
 0x1c6   : > { %3944 = vmatpush3.xpose.msk.msra.mxu1 %vm553_vm1, %v892_v20  ;;  %3968 = vmatprep.mubr.msk.f32.mxu0 %vm553_vm1, %v4739_v59 }
 0x1c7   : > { %3986 = vmatpush3.xpose.msk.msra.mxu0 %vm553_vm1, %v1231_v31  ;;  %3945 = vmatprep.subr.msk.mxu1 %vm553_vm1, %v890_v22  ;;  %v1112_v32 = vpop.permute.xlu1 %1111  ;;  %v1229_v33 = vpop.permute.xlu0 %1228 }
 0x1c8   : > { %3941 = vmatmul.mubr.msk.f32.gmra.mxu1 %vm553_vm1, %v4704_v50  ;;  %3987 = vmatprep.subr.msk.mxu0 %vm553_vm1, %v1229_v33  ;;  %v1478_v50 = vlaneseq }
 0x1c9   : > { %3969 = vmatmul.mubr.msk.f32.gmra.mxu0 %vm553_vm1, %v4735_v58  ;;  %3951 = vmatprep.mubr.msk.f32.mxu1 %vm553_vm1, %v4716_v53 }
 0x1ca   : > { %3946 = vmatpush3.xpose.msk.msra.mxu1 %vm553_vm1, %v890_v22  ;;  %3993 = vmatprep.mubr.msk.f32.mxu0 %vm553_vm1, %v4760_v1  ;;  %v4979_v51 = vshrl.u32 %v1478_v50, 7  ;;  %v1484_v53 = vand.u32 127, %v1478_v50 }
 0x1cb   : > { %3988 = vmatpush3.xpose.msk.msra.mxu0 %vm553_vm1, %v1229_v33  ;;  %3947 = vmatprep.subr.msk.mxu1 %vm553_vm1, %v888_v21  ;;  %v1227_v34 = vpop.permute.xlu0 %1226  ;;  %v1344_v35 = vpop.permute.xlu1 %1343 }
 0x1cc   : > { %3989 = vmatprep.subr.msk.mxu0 %vm553_vm1, %v1227_v34  ;;  %5931 = vst [vmem:[#allocation11_spill] sm:$0xff] %v4979_v51  ;;  %v1482_v56 = vadd.s32 24, %v4979_v51  ;;  %vm4988_vm3 = vcmp.le.s32.totalorder %v1484_v53, %v4979_v51 }
 0x1ce   : > { %3948 = vmatpush3.xpose.msk.msra.mxu1 %vm553_vm1, %v888_v21  ;;  %vm4999_vm4 = vcmp.le.s32.totalorder %v1484_v53, %v1482_v56 }
 0x1cf   : > { %3990 = vmatpush3.xpose.msk.msra.mxu0 %vm553_vm1, %v1227_v34  ;;  %3949 = vmatprep.subr.msk.mxu1 %vm553_vm1, %v886_v24  ;;  %v1225_v36 = vpop.permute.xlu0 %1224  ;;  %v1342_v37 = vpop.permute.xlu1 %1341 }
 0x1d0   : > { %3991 = vmatprep.subr.msk.mxu0 %vm553_vm1, %v1225_v36 }
 0x1d2   : > { %3950 = vmatpush3.xpose.msk.msra.mxu1 %vm553_vm1, %v886_v24 }
 0x1d3   : > { %3992 = vmatpush3.xpose.msk.msra.mxu0 %vm553_vm1, %v1225_v36  ;;  %v1340_v38 = vpop.permute.xlu1 %1339  ;;  %3971 = vmatprep.subr.msk.mxu1 %vm553_vm1, %v1118_v27  ;;  %v1997_v46 = vpop.permute.xlu0 %1996 }
 0x1d5   : > { %3952 = vmatmul.mubr.msk.f32.vlgmr.msra.gmra.mxu1 %vm553_vm1, %v4712_v52  ;;  %v1480_v52 = vadd.s32 8, %v4979_v51 }
 0x1d6   : > { %3994 = vmatmul.mubr.msk.f32.vlgmr.msra.gmra.mxu0 %vm553_vm1, %v4755_v0  ;;  %3954 = vmatprep.mubr.msk.f32.mxu1 %vm553_vm1, %v4724_v55 }
 0x1d7   : > { %3972 = vmatpush3.xpose.msk.msra.mxu1 %vm553_vm1, %v1118_v27  ;;  %3996 = vmatprep.mubr.msk.f32.mxu0 %vm553_vm1, %v4768_v3  ;;  %v1338_v39 = vpop.permute.xlu1 %1337  ;;  %v1993_v48 = vpop.permute.xlu0 %1992  ;;  %vm4982_vm2 = vcmp.le.s32.totalorder %v1484_v53, %v1480_v52 }
 0x1d8   : > { %3973 = vmatprep.subr.msk.mxu1 %vm553_vm1, %v1116_v29 }
 0x1d9   : > { %3955 = vmatmul.mubr.msk.f32.gmra.mxu1 %vm553_vm1, %v4720_v54 }
 0x1da   : > { %3997 = vmatmul.mubr.msk.f32.gmra.mxu0 %vm553_vm1, %v4762_v2  ;;  %3979 = vmatprep.mubr.msk.f32.mxu1 %vm553_vm1, %v4745_v61 }
 0x1db   : > { %3974 = vmatpush3.xpose.msk.msra.mxu1 %vm553_vm1, %v1116_v29  ;;  %v1888_v40 = vpop.permute.xlu1 %1887  ;;  %v4976_v49 = vpop.permute.xlu0 %2214 }
 0x1dc   : > { %3975 = vmatprep.subr.msk.mxu1 %vm553_vm1, %v1114_v30  ;;  %4013 = vmatprep.subr.mxu0 %v1888_v40 }
 0x1dd   : > { %4014 = vmatpush3.msra.mxu0 %v1888_v40 }
 0x1df   : > { %3976 = vmatpush3.xpose.msk.msra.mxu1 %vm553_vm1, %v1114_v30  ;;  %v1886_v41 = vpop.permute.xlu1 %1885 }
 0x1e0   : > { %3977 = vmatprep.subr.msk.mxu1 %vm553_vm1, %v1112_v32  ;;  %4015 = vmatprep.subr.mxu0 %v1886_v41 }
 0x1e1   : > { %4016 = vmatpush3.msra.mxu0 %v1886_v41 }
 0x1e3   : > { %3978 = vmatpush3.xpose.msk.msra.mxu1 %vm553_vm1, %v1112_v32  ;;  %v1995_v42 = vpop.permute.xlu1 %1994 }
 0x1e4   : > { %3999 = vmatprep.subr.msk.mxu1 %vm553_vm1, %v1344_v35 }
 0x1e6   : > { %3980 = vmatmul.mubr.msk.f32.vlgmr.msra.gmra.mxu1 %vm553_vm1, %v4741_v60  ;;  %v1481_v60 = vadd.s32 16, %v4979_v51 }
 0x1e7   : > { %3982 = vmatprep.mubr.msk.f32.mxu1 %vm553_vm1, %v4753_v63  ;;  %4000 = vmatpush3.xpose.msk.msra.mxu1 %vm553_vm1, %v1344_v35  ;;  %v1884_v43 = vpop.permute.xlu1 %1883 }
 0x1e8   : > { %4001 = vmatprep.subr.msk.mxu1 %vm553_vm1, %v1342_v37  ;;  %4017 = vmatprep.subr.mxu0 %v1884_v43  ;;  %vm5007_vm5 = vcmp.le.s32.totalorder %v1484_v53, %v1481_v60 }
 0x1e9   : > { %4018 = vmatpush3.msra.mxu0 %v1884_v43 }
 0x1ea   : > { %3983 = vmatmul.mubr.msk.f32.gmra.mxu1 %vm553_vm1, %v4747_v62 }
 0x1eb   : > { %4002 = vmatpush3.xpose.msk.msra.mxu1 %vm553_vm1, %v1342_v37  ;;  %4007 = vmatprep.mubr.msk.f32.mxu1 %vm553_vm1, %v4776_v5  ;;  %v1882_v44 = vpop.permute.xlu1 %1881 }
 0x1ec   : > { %4003 = vmatprep.subr.msk.mxu1 %vm553_vm1, %v1340_v38  ;;  %4019 = vmatprep.subr.mxu0 %v1882_v44 }
 0x1ed   : > { %4020 = vmatpush3.msra.mxu0 %v1882_v44 }
 0x1ef   : > { %4004 = vmatpush3.xpose.msk.msra.mxu1 %vm553_vm1, %v1340_v38  ;;  %v1991_v45 = vpop.permute.xlu1 %1990 }
 0x1f0   : > { %4005 = vmatprep.subr.msk.mxu1 %vm553_vm1, %v1338_v39 }
 0x1f3   : > { %4006 = vmatpush3.xpose.msk.msra.mxu1 %vm553_vm1, %v1338_v39  ;;  %v4967_v47 = vpop.permute.xlu1 %2105 }
 0x1f4   : > { %4027 = vmatprep.subr.mxu1 %v1997_v46  ;;  %4041 = vmatprep.subr.mxu0 %v4967_v47 }
 0x1f6   : > { %4008 = vmatmul.mubr.msk.f32.vlgmr.msra.gmra.mxu1 %vm553_vm1, %v4770_v4 }
 0x1f7   : > { %4010 = vmatprep.mubr.msk.f32.mxu1 %vm553_vm1, %v4784_v7  ;;  %4028 = vmatpush3.msra.mxu1 %v1997_v46 }
 0x1f8   : > { %4029 = vmatprep.subr.mxu1 %v1995_v42 }
 0x1f9   : > { %4030 = vmatpush3.msra.mxu1 %v1995_v42 }
 0x1fa   : > { %4011 = vmatmul.mubr.msk.f32.gmra.mxu1 %vm553_vm1, %v4778_v6  ;;  %4031 = vmatprep.subr.mxu1 %v1993_v48 }
 0x1fb   : > { %4032 = vmatpush3.msra.mxu1 %v1993_v48 }
 0x1fc   : > { %4033 = vmatprep.subr.mxu1 %v1991_v45 }
 0x1fd   : > { %4034 = vmatpush3.msra.mxu1 %v1991_v45 }
 0x1fe   : > { %4055 = vmatprep.subr.mxu1 %v4976_v49 }
 0x264   : > { %v3911_v54 = vpop.f32.mrf.mxu1 }
 0x265   : > { %v1447_v57 = vmul.f32 0.125, %v3911_v54 }
 0x266   : > { %v636_v58 = vpop.f32.mrf.mxu1 }
 0x267   : > { %v1446_v61 = vmul.f32 0.125, %v636_v58  ;;  %v4995_v62 = vsel %vm4982_vm2, %v1447_v57, -inf }
 0x268   : > { %v3914_v63 = vpop.f32.mrf.mxu1  ;;  %v1532_v2 = vsel %vm553_vm1, %v4995_v62, -inf }
 0x269   : > { %v1449_v6 = vmul.f32 0.125, %v3914_v63  ;;  %1533 = vmax.xlane.f32.xlu0 %v1532_v2  ;;  %v5005_v7 = vsel %vm4988_vm3, %v1446_v61, -inf }
 0x26a   : > { %v646_v8 = vpop.f32.mrf.mxu1  ;;  %v1529_v12 = vsel %vm553_vm1, %v5005_v7, -inf }
 0x26b   : > { %v1448_v10 = vmul.f32 0.125, %v646_v8  ;;  %v5013_v11 = vsel %vm4999_vm4, %v1449_v6, -inf }
 0x26c   : > { %v1538_v13 = vsel %vm553_vm1, %v5013_v11, -inf }
 0x26d   : > { %1530 = vmax.xlane.f32.xlu0 %v1529_v12  ;;  %1539 = vmax.xlane.f32.xlu1 %v1538_v13  ;;  %v5021_v14 = vsel %vm5007_vm5, %v1448_v10, -inf }
 0x26e   : > { %v1535_v15 = vsel %vm553_vm1, %v5021_v14, -inf }
 0x271   : > { %1536 = vmax.xlane.f32.xlu1 %v1535_v15 }
 0x274   : > { %v3925_v16 = vpop.f32.mrf.mxu1 }
 0x275   : > { %v1451_v17 = vmul.f32 0.125, %v3925_v16 }
 0x276   : > { %v749_v18 = vpop.f32.mrf.mxu1 }
 0x277   : > { %v1450_v19 = vmul.f32 0.125, %v749_v18  ;;  %v5027_v20 = vsel %vm4982_vm2, %v1451_v17, -inf }
 0x278   : > { %v3928_v21 = vpop.f32.mrf.mxu1  ;;  %v1544_v22 = vsel %vm553_vm1, %v5027_v20, -inf }
 0x279   : > { %v1453_v23 = vmul.f32 0.125, %v3928_v21  ;;  %1545 = vmax.xlane.f32.xlu0 %v1544_v22  ;;  %v5033_v24 = vsel %vm4988_vm3, %v1450_v19, -inf }
 0x27a   : > { %v759_v25 = vpop.f32.mrf.mxu1  ;;  %v1541_v26 = vsel %vm553_vm1, %v5033_v24, -inf }
 0x27b   : > { %v1452_v27 = vmul.f32 0.125, %v759_v25  ;;  %1542 = vmax.xlane.f32.xlu1 %v1541_v26  ;;  %v5039_v28 = vsel %vm4999_vm4, %v1453_v23, -inf }
 0x27c   : > { %v1550_v29 = vsel %vm553_vm1, %v5039_v28, -inf }
 0x27d   : > { %1551 = vmax.xlane.f32.xlu0 %v1550_v29  ;;  %v5045_v30 = vsel %vm5007_vm5, %v1452_v27, -inf }
 0x27e   : > { %v1547_v31 = vsel %vm553_vm1, %v5045_v30, -inf }
 0x281   : > { %1548 = vmax.xlane.f32.xlu0 %v1547_v31 }
 0x284   : > { %v3939_v32 = vpop.f32.mrf.mxu1 }
 0x285   : > { %v1455_v33 = vmul.f32 0.125, %v3939_v32  ;;  %v3967_v34 = vpop.f32.mrf.mxu0 }
 0x286   : > { %v1463_v35 = vmul.f32 0.125, %v3967_v34  ;;  %v862_v36 = vpop.f32.mrf.mxu1 }
 0x287   : > { %v5051_v37 = vsel %vm4982_vm2, %v1455_v33, -inf  ;;  %v1454_v39 = vmul.f32 0.125, %v862_v36  ;;  %v1088_v41 = vpop.f32.mrf.mxu0 }
 0x288   : > { %v1556_v38 = vsel %vm553_vm1, %v5051_v37, -inf  ;;  %v5057_v40 = vsel %vm4982_vm2, %v1463_v35, -inf  ;;  %v1462_v43 = vmul.f32 0.125, %v1088_v41  ;;  %v3942_v45 = vpop.f32.mrf.mxu1 }
 0x289   : > { %1557 = vmax.xlane.f32.xlu1 %v1556_v38  ;;  %v1580_v42 = vsel %vm553_vm1, %v5057_v40, -inf  ;;  %v5063_v44 = vsel %vm4988_vm3, %v1454_v39, -inf  ;;  %v1457_v48 = vmul.f32 0.125, %v3942_v45  ;;  %v3970_v52 = vpop.f32.mrf.mxu0 }
 0x28a   : > { %v1553_v46 = vsel %vm553_vm1, %v5063_v44, -inf  ;;  %v5069_v50 = vsel %vm4988_vm3, %v1462_v43, -inf  ;;  %v872_v53 = vpop.f32.mrf.mxu1  ;;  %v1465_v56 = vmul.f32 0.125, %v3970_v52 }
 0x28b   : > { %v1577_v54 = vsel %vm553_vm1, %v5069_v50, -inf  ;;  %v5075_v58 = vsel %vm4999_vm4, %v1457_v48, -inf  ;;  %v1456_v8 = vmul.f32 0.125, %v872_v53  ;;  %v1098_v15 = vpop.f32.mrf.mxu0 }
 0x28c   : > { %v1562_v6 = vsel %vm553_vm1, %v5075_v58, -inf  ;;  %v5087_v13 = vsel %vm4999_vm4, %v1465_v56, -inf  ;;  %v1464_v21 = vmul.f32 0.125, %v1098_v15 }
 0x28d   : > { %1581 = vmax.xlane.f32.xlu1 %v1580_v42  ;;  %v1586_v19 = vsel %vm553_vm1, %v5087_v13, -inf  ;;  %v5099_v23 = vsel %vm5007_vm5, %v1456_v8, -inf }
 0x28e   : > { %v1559_v29 = vsel %vm553_vm1, %v5099_v23, -inf  ;;  %v5111_v33 = vsel %vm5007_vm5, %v1464_v21, -inf }
 0x28f   : > { %v1583_v36 = vsel %vm553_vm1, %v5111_v33, -inf }
 0x291   : > { %1554 = vmax.xlane.f32.xlu1 %v1553_v46 }
 0x295   : > { %v3953_v57 = vpop.f32.mrf.mxu1  ;;  %1578 = vmax.xlane.f32.xlu1 %v1577_v54 }
 0x296   : > { %v1459_v60 = vmul.f32 0.125, %v3953_v57  ;;  %v3995_v25 = vpop.f32.mrf.mxu0 }
 0x297   : > { %v975_v61 = vpop.f32.mrf.mxu1  ;;  %v1471_v31 = vmul.f32 0.125, %v3995_v25 }
 0x298   : > { %v1458_v63 = vmul.f32 0.125, %v975_v61  ;;  %v5079_v2 = vsel %vm4982_vm2, %v1459_v60, -inf  ;;  %v1314_v34 = vpop.f32.mrf.mxu0 }
 0x299   : > { %v3956_v10 = vpop.f32.mrf.mxu1  ;;  %v1568_v12 = vsel %vm553_vm1, %v5079_v2, -inf  ;;  %1563 = vmax.xlane.f32.xlu1 %v1562_v6  ;;  %v1470_v38 = vmul.f32 0.125, %v1314_v34  ;;  %v5123_v41 = vsel %vm4982_vm2, %v1471_v31, -inf }
 0x29a   : > { %v1461_v16 = vmul.f32 0.125, %v3956_v10  ;;  %1569 = vmax.xlane.f32.xlu0 %v1568_v12  ;;  %v5091_v17 = vsel %vm4988_vm3, %v1458_v63, -inf  ;;  %v3998_v42 = vpop.f32.mrf.mxu0  ;;  %v1604_v48 = vsel %vm553_vm1, %v5123_v41, -inf }
 0x29b   : > { %v985_v18 = vpop.f32.mrf.mxu1  ;;  %v1565_v22 = vsel %vm553_vm1, %v5091_v17, -inf  ;;  %v1473_v52 = vmul.f32 0.125, %v3998_v42  ;;  %v5133_v56 = vsel %vm4988_vm3, %v1470_v38, -inf }
 0x29c   : > { %v1460_v26 = vmul.f32 0.125, %v985_v18  ;;  %v5103_v27 = vsel %vm4999_vm4, %v1461_v16, -inf  ;;  %v1324_v57 = vpop.f32.mrf.mxu0  ;;  %v1601_v10 = vsel %vm553_vm1, %v5133_v56, -inf }
 0x29d   : > { %1587 = vmax.xlane.f32.xlu1 %v1586_v19  ;;  %v1574_v32 = vsel %vm553_vm1, %v5103_v27, -inf  ;;  %v1472_v12 = vmul.f32 0.125, %v1324_v57  ;;  %v5145_v15 = vsel %vm4999_vm4, %v1473_v52, -inf }
 0x29e   : > { %1566 = vmax.xlane.f32.xlu0 %v1565_v22  ;;  %v5115_v35 = vsel %vm5007_vm5, %v1460_v26, -inf  ;;  %v1610_v21 = vsel %vm553_vm1, %v5145_v15, -inf }
 0x29f   : > { %v1571_v39 = vsel %vm553_vm1, %v5115_v35, -inf  ;;  %v5157_v22 = vsel %vm5007_vm5, %v1472_v12, -inf }
 0x2a1   : > { %1560 = vmax.xlane.f32.xlu1 %v1559_v29  ;;  %v1607_v29 = vsel %vm553_vm1, %v5157_v22, -inf }
 0x2a2   : > { %1575 = vmax.xlane.f32.xlu0 %v1574_v32 }
 0x2a5   : > { %1584 = vmax.xlane.f32.xlu1 %v1583_v36 }
 0x2a6   : > { %v3981_v43 = vpop.f32.mrf.mxu1  ;;  %1572 = vmax.xlane.f32.xlu0 %v1571_v39 }
 0x2a7   : > { %v1467_v45 = vmul.f32 0.125, %v3981_v43 }
 0x2a8   : > { %v1201_v46 = vpop.f32.mrf.mxu1 }
 0x2a9   : > { %v1466_v53 = vmul.f32 0.125, %v1201_v46  ;;  %v5129_v54 = vsel %vm4982_vm2, %v1467_v45, -inf  ;;  %1605 = vmax.xlane.f32.xlu1 %v1604_v48  ;;  %v5179_v48 = vpop.permute.xlu1 %2103 }
 0x2aa   : > { %v3984_v60 = vpop.f32.mrf.mxu1  ;;  %v1592_v61 = vsel %vm553_vm1, %v5129_v54, -inf }
 0x2ab   : > { %v1469_v63 = vmul.f32 0.125, %v3984_v60  ;;  %1593 = vmax.xlane.f32.xlu0 %v1592_v61  ;;  %v5139_v6 = vsel %vm4988_vm3, %v1466_v53, -inf }
 0x2ac   : > { %v1211_v8 = vpop.f32.mrf.mxu1  ;;  %v1589_v16 = vsel %vm553_vm1, %v5139_v6, -inf }
 0x2ad   : > { %1602 = vmax.xlane.f32.xlu1 %v1601_v10  ;;  %v1468_v18 = vmul.f32 0.125, %v1211_v8  ;;  %v5151_v19 = vsel %vm4999_vm4, %v1469_v63, -inf  ;;  %v5187_v60 = vpop.permute.xlu1 %2212  ;;  %v5195_v63 = vpop.permute.xlu0 %2101 }
 0x2ae   : > { %v1598_v25 = vsel %vm553_vm1, %v5151_v19, -inf }
 0x2af   : > { %1590 = vmax.xlane.f32.xlu0 %v1589_v16  ;;  %v5163_v26 = vsel %vm5007_vm5, %v1468_v18, -inf }
 0x2b0   : > { %v1595_v32 = vsel %vm553_vm1, %v5163_v26, -inf }
 0x2b1   : > { %1611 = vmax.xlane.f32.xlu1 %v1610_v21  ;;  %v5201_v3 = vpop.permute.xlu1 %2210  ;;  %v5203_v10 = vpop.permute.xlu0 %2099 }
 0x2b3   : > { %1599 = vmax.xlane.f32.xlu0 %v1598_v25 }
 0x2b5   : > { %1608 = vmax.xlane.f32.xlu1 %v1607_v29  ;;  %v5205_v12 = vpop.permute.xlu1 %2208  ;;  %v5207_v16 = vpop.permute.xlu0 %2323 }
 0x2b6   : > { %v4009_v31 = vpop.f32.mrf.mxu1 }
 0x2b7   : > { %v1475_v34 = vmul.f32 0.125, %v4009_v31  ;;  %1596 = vmax.xlane.f32.xlu0 %v1595_v32 }
 0x2b8   : > { %v1427_v36 = vpop.f32.mrf.mxu1 }
 0x2b9   : > { %v1474_v38 = vmul.f32 0.125, %v1427_v36  ;;  %v5171_v39 = vsel %vm4982_vm2, %v1475_v34, -inf  ;;  %v5209_v9 = vpop.permute.xlu1 %2432  ;;  %v5211_v18 = vpop.permute.xlu0 %2321 }
 0x2ba   : > { %v4012_v42 = vpop.f32.mrf.mxu1  ;;  %v1616_v43 = vsel %vm553_vm1, %v5171_v39, -inf }
 0x2bb   : > { %v1477_v45 = vmul.f32 0.125, %v4012_v42  ;;  %1617 = vmax.xlane.f32.xlu0 %v1616_v43  ;;  %v5177_v46 = vsel %vm4988_vm3, %v1474_v38, -inf }
 0x2bc   : > { %v1437_v52 = vpop.f32.mrf.mxu1  ;;  %v1613_v53 = vsel %vm553_vm1, %v5177_v46, -inf }
 0x2bd   : > { %v1476_v57 = vmul.f32 0.125, %v1437_v52  ;;  %v5185_v55 = vsel %vm4999_vm4, %v1477_v45, -inf  ;;  %v5213_v21 = vpop.permute.xlu1 %2430  ;;  %v5215_v25 = vpop.permute.xlu0 %2319 }
 0x2be   : > { %v1622_v61 = vsel %vm553_vm1, %v5185_v55, -inf }
 0x2bf   : > { %1614 = vmax.xlane.f32.xlu0 %v1613_v53  ;;  %v5193_v59 = vsel %vm5007_vm5, %v1476_v57, -inf }
 0x2c0   : > { %v1619_v8 = vsel %vm553_vm1, %v5193_v59, -inf }
 0x2c1   : > { %v5221_v29 = vpop.permute.xlu0 %2317 }
 0x2c3   : > { %1623 = vmax.xlane.f32.xlu0 %v1622_v61 }
 0x2c5   : > { %v5225_v32 = vpop.permute.xlu0 %2541 }
 0x2c6   : > { %2646 = vrot.lane.b32.xlu1 %v4770_v4, %s4446_s17  ;;  %v5219_v4 = vpop.permute.xlu1 %2428 }
 0x2c7   : > { %1620 = vmax.xlane.f32.xlu0 %v1619_v8 }
 0x2c9   : > { %v5229_v36 = vpop.permute.xlu0 %2539 }
 0x2ca   : > { %v5223_v31 = vpop.permute.xlu1 %2426 }
 0x2cb   : > { %5940 = vst [vmem:[#allocation12_spill] sm:$0xff] %v5223_v31 }
 0x2ce   : > { %v5227_v34 = vpop.permute.xlu1 %2650 }
 0x2cf   : > { %5941 = vst [vmem:[#allocation13_spill] sm:$0xff] %v5227_v34 }
 0x2d2   : > { %v5231_v38 = vpop.permute.xlu1 %2648 }
 0x2d3   : > { %5942 = vst [vmem:[#allocation14_spill] sm:$0xff] %v5231_v38 }
 0x2dd   : > { %2537 = vrot.lane.b32.xlu0 %v4755_v0, %s4446_s17 }
 0x2f2   : > { %v1534_v42 = vpop.xlane.xlu0 %1533 }
 0x2f3   : > { %v1626_v43 = vsub.f32 %v4995_v62, %v1534_v42 }
 0x2f5   : > { %v1659_v45 = vmul.f32 1.442695, %v1626_v43 }
 0x2f6   : > { %v1531_v52 = vpop.xlane.xlu0 %1530  ;;  %v1540_v0 = vpop.xlane.xlu1 %1539 }
 0x2f7   : > { %4189 = vpow2.f32 %v1659_v45  ;;  %v1625_v53 = vsub.f32 %v5005_v7, %v1531_v52  ;;  %v1628_v57 = vsub.f32 %v5013_v11, %v1540_v0 }
 0x2f9   : > { %v1657_v61 = vmul.f32 1.442695, %v1625_v53  ;;  %v1663_v8 = vmul.f32 1.442695, %v1628_v57 }
 0x2fa   : > { %v1537_v51 = vpop.xlane.xlu1 %1536 }
 0x2fb   : > { %4191 = vpow2.f32 %v1657_v61  ;;  %v1627_v34 = vsub.f32 %v5021_v14, %v1537_v51 }
 0x2fc   : > { %4193 = vpow2.f32 %v1663_v8 }
 0x2fd   : > { %v1661_v31 = vmul.f32 1.442695, %v1627_v34 }
 0x2ff   : > { %4195 = vpow2.f32 %v1661_v31 }
 0x302   : > { %v1546_v38 = vpop.xlane.xlu0 %1545 }
 0x303   : > { %v1630_v62 = vsub.f32 %v5027_v20, %v1546_v38 }
 0x304   : > { %v5238_v42 = vpop.eup %4189  ;;  %v1543_v43 = vpop.xlane.xlu1 %1542 }
 0x305   : > { %v1667_v45 = vmul.f32 1.442695, %v1630_v62  ;;  %v1629_v7 = vsub.f32 %v5033_v24, %v1543_v43  ;;  %v1724_v11 = vsel %vm553_vm1, %v5238_v42, 0.0 }
 0x306   : > { %v1552_v52 = vpop.xlane.xlu0 %1551  ;;  %1725 = vadd.xlane.f32.xlu1 %v1724_v11 }
 0x307   : > { %4197 = vpow2.f32 %v1667_v45  ;;  %v1665_v0 = vmul.f32 1.442695, %v1629_v7  ;;  %v1632_v51 = vsub.f32 %v5039_v28, %v1552_v52 }
 0x308   : > { %v5244_v14 = vpop.eup %4191 }
 0x309   : > { %4199 = vpow2.f32 %v1665_v0  ;;  %v1671_v31 = vmul.f32 1.442695, %v1632_v51  ;;  %v1721_v20 = vsel %vm553_vm1, %v5244_v14, 0.0  ;;  %v5248_v34 = vpop.eup %4193 }
 0x30a   : > { %v1549_v38 = vpop.xlane.xlu0 %1548  ;;  %1722 = vadd.xlane.f32.xlu1 %v1721_v20  ;;  %v1730_v57 = vsel %vm553_vm1, %v5248_v34, 0.0 }
 0x30b   : > { %v1631_v24 = vsub.f32 %v5045_v30, %v1549_v38  ;;  %4201 = vpow2.f32 %v1671_v31 }
 0x30c   : > { %v5253_v61 = vpop.eup %4195 }
 0x30d   : > { %v1669_v53 = vmul.f32 1.442695, %v1631_v24  ;;  %v1727_v28 = vsel %vm553_vm1, %v5253_v61, 0.0 }
 0x30e   : > { %1731 = vadd.xlane.f32.xlu1 %v1730_v57 }
 0x30f   : > { %4203 = vpow2.f32 %v1669_v53 }
 0x312   : > { %v1558_v8 = vpop.xlane.xlu1 %1557  ;;  %1728 = vadd.xlane.f32.xlu1 %v1727_v28 }
 0x313   : > { %v1634_v62 = vsub.f32 %v5051_v37, %v1558_v8 }
 0x314   : > { %v5258_v43 = vpop.eup %4197 }
 0x315   : > { %v1675_v45 = vmul.f32 1.442695, %v1634_v62  ;;  %v1736_v30 = vsel %vm553_vm1, %v5258_v43, 0.0 }
 0x316   : > { %v5262_v7 = vpop.eup %4199  ;;  %1737 = vadd.xlane.f32.xlu0 %v1736_v30  ;;  %v1582_v11 = vpop.xlane.xlu1 %1581 }
 0x317   : > { %4205 = vpow2.f32 %v1675_v45  ;;  %v1642_v52 = vsub.f32 %v5057_v40, %v1582_v11  ;;  %v1733_v51 = vsel %vm553_vm1, %v5262_v7, 0.0 }
 0x318   : > { %v5267_v31 = vpop.eup %4201 }
 0x319   : > { %v1691_v0 = vmul.f32 1.442695, %v1642_v52  ;;  %v1742_v24 = vsel %vm553_vm1, %v5267_v31, 0.0 }
 0x31a   : > { %1734 = vadd.xlane.f32.xlu0 %v1733_v51  ;;  %v1555_v37 = vpop.xlane.xlu1 %1554 }
 0x31b   : > { %4207 = vpow2.f32 %v1691_v0  ;;  %v1633_v20 = vsub.f32 %v5063_v44, %v1555_v37 }
 0x31c   : > { %v5272_v53 = vpop.eup %4203 }
 0x31d   : > { %v1673_v38 = vmul.f32 1.442695, %v1633_v20  ;;  %v1739_v8 = vsel %vm553_vm1, %v5272_v53, 0.0 }
 0x31e   : > { %1743 = vadd.xlane.f32.xlu0 %v1742_v24  ;;  %v1579_v57 = vpop.xlane.xlu1 %1578 }
 0x31f   : > { %4209 = vpow2.f32 %v1673_v38  ;;  %v1641_v40 = vsub.f32 %v5069_v50, %v1579_v57 }
 0x321   : > { %v1689_v28 = vmul.f32 1.442695, %v1641_v40 }
 0x322   : > { %1740 = vadd.xlane.f32.xlu0 %v1739_v8  ;;  %v1564_v62 = vpop.xlane.xlu1 %1563 }
 0x323   : > { %4211 = vpow2.f32 %v1689_v28  ;;  %v1570_v45 = vpop.xlane.xlu0 %1569  ;;  %v1636_v44 = vsub.f32 %v5075_v58, %v1564_v62 }
 0x324   : > { %v5278_v30 = vpop.eup %4205  ;;  %v1638_v11 = vsub.f32 %v5079_v2, %v1570_v45 }
 0x325   : > { %v1679_v52 = vmul.f32 1.442695, %v1636_v44  ;;  %v1748_v0 = vsel %vm553_vm1, %v5278_v30, 0.0 }
 0x326   : > { %v1683_v51 = vmul.f32 1.442695, %v1638_v11  ;;  %v1588_v50 = vpop.xlane.xlu1 %1587  ;;  %1749 = vadd.xlane.f32.xlu1 %v1748_v0 }
 0x327   : > { %4213 = vpow2.f32 %v1679_v52  ;;  %v1567_v37 = vpop.xlane.xlu0 %1566  ;;  %v1644_v20 = vsub.f32 %v5087_v13, %v1588_v50 }
 0x328   : > { %v5284_v38 = vpop.eup %4207  ;;  %4215 = vpow2.f32 %v1683_v51  ;;  %v1637_v52 = vsub.f32 %v5091_v17, %v1567_v37 }
 0x329   : > { %v1695_v24 = vmul.f32 1.442695, %v1644_v20  ;;  %v1772_v58 = vsel %vm553_vm1, %v5284_v38, 0.0 }
 0x32a   : > { %v1561_v57 = vpop.xlane.xlu1 %1560  ;;  %1773 = vadd.xlane.f32.xlu1 %v1772_v58 }
 0x32b   : > { %4217 = vpow2.f32 %v1695_v24  ;;  %v1576_v2 = vpop.xlane.xlu0 %1575  ;;  %v1635_v40 = vsub.f32 %v5099_v23, %v1561_v57  ;;  %v1681_v57 = vmul.f32 1.442695, %v1637_v52 }
 0x32c   : > { %v5289_v28 = vpop.eup %4209 }
 0x32d   : > { %v1677_v8 = vmul.f32 1.442695, %v1635_v40  ;;  %v1745_v62 = vsel %vm553_vm1, %v5289_v28, 0.0 }
 0x32e   : > { %v1585_v13 = vpop.xlane.xlu1 %1584  ;;  %1746 = vadd.xlane.f32.xlu1 %v1745_v62 }
 0x32f   : > { %4219 = vpow2.f32 %v1677_v8  ;;  %v1573_v45 = vpop.xlane.xlu0 %1572  ;;  %v1643_v44 = vsub.f32 %v5111_v33, %v1585_v13  ;;  %v1640_v13 = vsub.f32 %v5103_v27, %v1576_v2 }
 0x330   : > { %v5294_v11 = vpop.eup %4211  ;;  %v1639_v2 = vsub.f32 %v5115_v35, %v1573_v45 }
 0x331   : > { %v1693_v0 = vmul.f32 1.442695, %v1643_v44  ;;  %v1769_v23 = vsel %vm553_vm1, %v5294_v11, 0.0 }
 0x332   : > { %v1606_v51 = vpop.xlane.xlu1 %1605  ;;  %1770 = vadd.xlane.f32.xlu1 %v1769_v23 }
 0x333   : > { %4221 = vpow2.f32 %v1693_v0  ;;  %v1650_v50 = vsub.f32 %v5123_v41, %v1606_v51 }
 0x334   : > { %v5300_v20 = vpop.eup %4213  ;;  %v1594_v24 = vpop.xlane.xlu0 %1593 }
 0x335   : > { %v5302_v58 = vpop.eup %4215  ;;  %v1707_v33 = vmul.f32 1.442695, %v1650_v50  ;;  %v1754_v40 = vsel %vm553_vm1, %v5300_v20, 0.0  ;;  %v1687_v50 = vmul.f32 1.442695, %v1640_v13 }
 0x336   : > { %v1760_v17 = vsel %vm553_vm1, %v5302_v58, 0.0  ;;  %v1603_v37 = vpop.xlane.xlu1 %1602  ;;  %1755 = vadd.xlane.f32.xlu1 %v1754_v40 }
 0x337   : > { %4223 = vpow2.f32 %v1707_v33  ;;  %1761 = vadd.xlane.f32.xlu0 %v1760_v17  ;;  %v1649_v8 = vsub.f32 %v5133_v56, %v1603_v37 }
 0x338   : > { %v5309_v41 = vpop.eup %4217  ;;  %v1591_v62 = vpop.xlane.xlu0 %1590  ;;  %4225 = vpow2.f32 %v1681_v57 }
 0x339   : > { %v1705_v44 = vmul.f32 1.442695, %v1649_v8  ;;  %v1778_v52 = vsel %vm553_vm1, %v5309_v41, 0.0 }
 0x33a   : > { %v1612_v0 = vpop.xlane.xlu1 %1611  ;;  %1779 = vadd.xlane.f32.xlu1 %v1778_v52 }
 0x33b   : > { %4227 = vpow2.f32 %v1705_v44  ;;  %v1652_v33 = vsub.f32 %v5145_v15, %v1612_v0  ;;  %v1685_v44 = vmul.f32 1.442695, %v1639_v2 }
 0x33c   : > { %v5314_v23 = vpop.eup %4219  ;;  %v1600_v51 = vpop.xlane.xlu0 %1599  ;;  %4229 = vpow2.f32 %v1687_v50  ;;  %v1646_v50 = vsub.f32 %v5129_v54, %v1594_v24 }
 0x33d   : > { %v1751_v56 = vsel %vm553_vm1, %v5314_v23, 0.0  ;;  %v1711_v40 = vmul.f32 1.442695, %v1652_v33  ;;  %v1648_v24 = vsub.f32 %v5151_v19, %v1600_v51 }
 0x33e   : > { %1752 = vadd.xlane.f32.xlu1 %v1751_v56  ;;  %v1609_v17 = vpop.xlane.xlu1 %1608 }
 0x33f   : > { %v1651_v15 = vsub.f32 %v5157_v22, %v1609_v17  ;;  %4231 = vpow2.f32 %v1711_v40  ;;  %v1645_v40 = vsub.f32 %v5139_v6, %v1591_v62 }
 0x340   : > { %v5319_v57 = vpop.eup %4221  ;;  %v1597_v27 = vpop.xlane.xlu0 %1596  ;;  %4233 = vpow2.f32 %v1685_v44 }
 0x341   : > { %v1775_v37 = vsel %vm553_vm1, %v5319_v57, 0.0  ;;  %v1709_v35 = vmul.f32 1.442695, %v1651_v15  ;;  %v1697_v54 = vmul.f32 1.442695, %v1645_v40 }
 0x342   : > { %1776 = vadd.xlane.f32.xlu1 %v1775_v37  ;;  %v1699_v37 = vmul.f32 1.442695, %v1646_v50  ;;  %v1647_v50 = vsub.f32 %v5163_v26, %v1597_v27 }
 0x343   : > { %4235 = vpow2.f32 %v1709_v35 }
 0x344   : > { %v5324_v8 = vpop.eup %4223  ;;  %v1618_v13 = vpop.xlane.xlu0 %1617 }
 0x345   : > { %v1796_v52 = vsel %vm553_vm1, %v5324_v8, 0.0  ;;  %v5329_v0 = vpop.eup %4225  ;;  %v1654_v51 = vsub.f32 %v5171_v39, %v1618_v13 }
 0x346   : > { %1797 = vadd.xlane.f32.xlu0 %v1796_v52  ;;  %v1757_v56 = vsel %vm553_vm1, %v5329_v0, 0.0 }
 0x347   : > { %v1715_v27 = vmul.f32 1.442695, %v1654_v51 }
 0x348   : > { %v1615_v45 = vpop.xlane.xlu0 %1614  ;;  %v5335_v22 = vpop.eup %4227 }
 0x349   : > { %v1653_v33 = vsub.f32 %v5177_v46, %v1615_v45  ;;  %v1793_v15 = vsel %vm553_vm1, %v5335_v22, 0.0  ;;  %v5340_v44 = vpop.eup %4229  ;;  %v1703_v45 = vmul.f32 1.442695, %v1648_v24 }
 0x34a   : > { %1758 = vadd.xlane.f32.xlu0 %v1757_v56  ;;  %v1766_v6 = vsel %vm553_vm1, %v5340_v44, 0.0 }
 0x34b   : > { %v1713_v2 = vmul.f32 1.442695, %v1653_v33 }
 0x34c   : > { %v1624_v17 = vpop.xlane.xlu0 %1623  ;;  %v5346_v62 = vpop.eup %4231 }
 0x34d   : > { %4237 = vpow2.f32 %v1713_v2  ;;  %v1802_v33 = vsel %vm553_vm1, %v5346_v62, 0.0  ;;  %v5351_v56 = vpop.eup %4233 }
 0x34e   : > { %1794 = vadd.xlane.f32.xlu0 %v1793_v15  ;;  %4239 = vpow2.f32 %v1699_v37  ;;  %v1763_v2 = vsel %vm553_vm1, %v5351_v56, 0.0  ;;  %v1656_v37 = vsub.f32 %v5185_v55, %v1624_v17 }
 0x34f   : > { %4241 = vpow2.f32 %v1697_v54 }
 0x350   : > { %v1621_v46 = vpop.xlane.xlu0 %1620  ;;  %v5353_v19 = vpop.eup %4235  ;;  %v1719_v13 = vmul.f32 1.442695, %v1656_v37 }
 0x351   : > { %v1655_v52 = vsub.f32 %v5193_v59, %v1621_v46  ;;  %v1701_v59 = vmul.f32 1.442695, %v1647_v50  ;;  %v1799_v15 = vsel %vm553_vm1, %v5353_v19, 0.0 }
 0x352   : > { %1767 = vadd.xlane.f32.xlu0 %v1766_v6 }
 0x353   : > { %v1717_v35 = vmul.f32 1.442695, %v1655_v52 }
 0x355   : > { %4243 = vpow2.f32 %v1717_v35 }
 0x356   : > { %1803 = vadd.xlane.f32.xlu0 %v1802_v33  ;;  %4245 = vpow2.f32 %v1703_v45 }
 0x357   : > { %4247 = vpow2.f32 %v1701_v59 }
 0x358   : > { %4249 = vpow2.f32 %v1715_v27 }
 0x359   : > { %4251 = vpow2.f32 %v1719_v13 }
 0x35a   : > { %v5358_v40 = vpop.eup %4237  ;;  %1764 = vadd.xlane.f32.xlu0 %v1763_v2  ;;  %v5395_v2 = vpop.permute.xlu1 %2646 }
 0x35b   : > { %v1805_v26 = vsel %vm553_vm1, %v5358_v40, 0.0  ;;  %v5365_v54 = vpop.eup %4239 }
 0x35c   : > { %1806 = vadd.xlane.f32.xlu1 %v1805_v26  ;;  %v5367_v39 = vpop.eup %4241  ;;  %v1784_v46 = vsel %vm553_vm1, %v5365_v54, 0.0 }
 0x35d   : > { %v1781_v55 = vsel %vm553_vm1, %v5367_v39, 0.0 }
 0x35e   : > { %1800 = vadd.xlane.f32.xlu0 %v1799_v15  ;;  %v5399_v15 = vpop.permute.xlu0 %2537 }
 0x362   : > { %v5371_v24 = vpop.eup %4243  ;;  %1785 = vadd.xlane.f32.xlu0 %v1784_v46 }
 0x363   : > { %v1811_v52 = vsel %vm553_vm1, %v5371_v24, 0.0  ;;  %v5377_v17 = vpop.eup %4245 }
 0x364   : > { %1812 = vadd.xlane.f32.xlu1 %v1811_v52  ;;  %v1790_v6 = vsel %vm553_vm1, %v5377_v17, 0.0  ;;  %v5381_v35 = vpop.eup %4247 }
 0x365   : > { %v1787_v45 = vsel %vm553_vm1, %v5381_v35, 0.0  ;;  %v5385_v50 = vpop.eup %4249 }
 0x366   : > { %1782 = vadd.xlane.f32.xlu0 %v1781_v55  ;;  %v1808_v33 = vsel %vm553_vm1, %v5385_v50, 0.0  ;;  %v5389_v59 = vpop.eup %4251 }
 0x367   : > { %v1814_v51 = vsel %vm553_vm1, %v5389_v59, 0.0 }
 0x36a   : > { %1791 = vadd.xlane.f32.xlu0 %v1790_v6 }
 0x36e   : > { %1788 = vadd.xlane.f32.xlu0 %v1787_v45 }
 0x372   : > { %1809 = vadd.xlane.f32.xlu0 %v1808_v33 }
 0x375   : > { %2644 = vrot.lane.b32.xlu1 %v4776_v5, %s4446_s17 }
 0x376   : > { %1815 = vadd.xlane.f32.xlu0 %v1814_v51 }
 0x38c   : > { %2535 = vrot.lane.b32.xlu0 %v4760_v1, %s4446_s17 }
 0x38f   : > { %v1726_v26 = vpop.xlane.xlu1 %1725 }
 0x390   : > { %4253 = vrcp.f32 %v1726_v26 }
 0x393   : > { %v1723_v27 = vpop.xlane.xlu1 %1722 }
 0x394   : > { %4255 = vrcp.f32 %v1723_v27 }
 0x397   : > { %v1732_v37 = vpop.xlane.xlu1 %1731 }
 0x398   : > { %4257 = vrcp.f32 %v1732_v37 }
 0x39b   : > { %v1729_v13 = vpop.xlane.xlu1 %1728 }
 0x39c   : > { %4259 = vrcp.f32 %v1729_v13 }
 0x39d   : > { %v4254_v46 = vpop.eup %4253 }
 0x39e   : > { %v1850_v6 = vmul.f32 %v4254_v46, %v5238_v42 }
 0x39f   : > { %v1738_v5 = vpop.xlane.xlu0 %1737 }
 0x3a0   : > { %4261 = vrcp.f32 %v1738_v5 }
 0x3a1   : > { %v4256_v52 = vpop.eup %4255 }
 0x3a2   : > { %v1849_v55 = vmul.f32 %v4256_v52, %v5244_v14 }
 0x3a3   : > { %v1735_v45 = vpop.xlane.xlu0 %1734 }
 0x3a4   : > { %4263 = vrcp.f32 %v1735_v45  ;;  %4021 = vmatprep.mubr.msk.f32.mxu0 %vm553_vm1, %v1849_v55 }
 0x3a5   : > { %4022 = vmatmul.mubr.msk.f32.vlgmr.msra.gmra.mxu0 %vm553_vm1, %v1850_v6  ;;  %v4258_v33 = vpop.eup %4257 }
 0x3a6   : > { %4042 = vmatpush3.msra.mxu0 %v4967_v47  ;;  %v1852_v26 = vmul.f32 %v4258_v33, %v5248_v34 }
 0x3a7   : > { %4043 = vmatprep.subr.mxu0 %v5179_v48  ;;  %v1744_v1 = vpop.xlane.xlu0 %1743 }
 0x3a8   : > { %4044 = vmatpush3.msra.mxu0 %v5179_v48  ;;  %4265 = vrcp.f32 %v1744_v1 }
 0x3a9   : > { %v4260_v51 = vpop.eup %4259  ;;  %4045 = vmatprep.subr.mxu0 %v5195_v63 }
 0x3aa   : > { %4046 = vmatpush3.msra.mxu0 %v5195_v63  ;;  %v1851_v42 = vmul.f32 %v4260_v51, %v5253_v61 }
 0x3ab   : > { %4047 = vmatprep.subr.mxu0 %v5203_v10  ;;  %v1741_v14 = vpop.xlane.xlu0 %1740 }
 0x3ac   : > { %4267 = vrcp.f32 %v1741_v14  ;;  %4048 = vmatpush3.msra.mxu0 %v5203_v10  ;;  %4024 = vmatprep.mubr.msk.f32.mxu0 %vm553_vm1, %v1851_v42 }
 0x3ad   : > { %4069 = vmatprep.subr.mxu0 %v5207_v16  ;;  %4025 = vmatmul.mubr.msk.f32.gmra.mxu0 %vm553_vm1, %v1852_v26  ;;  %v4262_v48 = vpop.eup %4261 }
 0x3ae   : > { %v1854_v27 = vmul.f32 %v4262_v48, %v5258_v43 }
 0x3af   : > { %v1750_v47 = vpop.xlane.xlu1 %1749 }
 0x3b0   : > { %4269 = vrcp.f32 %v1750_v47 }
 0x3b1   : > { %v4264_v63 = vpop.eup %4263 }
 0x3b2   : > { %v1853_v61 = vmul.f32 %v4264_v63, %v5262_v7 }
 0x3b3   : > { %v1774_v37 = vpop.xlane.xlu1 %1773 }
 0x3b4   : > { %4035 = vmatprep.mubr.msk.f32.mxu1 %vm553_vm1, %v1853_v61 }
 0x3b5   : > { %4036 = vmatmul.mubr.msk.f32.vlgmr.msra.gmra.mxu1 %vm553_vm1, %v1854_v27  ;;  %v4266_v34 = vpop.eup %4265 }
 0x3b6   : > { %4056 = vmatpush3.msra.mxu1 %v4976_v49  ;;  %v1856_v49 = vmul.f32 %v4266_v34, %v5267_v31 }
 0x3b7   : > { %4057 = vmatprep.subr.mxu1 %v5187_v60  ;;  %v1747_v10 = vpop.xlane.xlu1 %1746 }
 0x3b8   : > { %4058 = vmatpush3.msra.mxu1 %v5187_v60  ;;  %4271 = vrcp.f32 %v1747_v10 }
 0x3b9   : > { %v4268_v13 = vpop.eup %4267  ;;  %4059 = vmatprep.subr.mxu1 %v5201_v3 }
 0x3ba   : > { %4060 = vmatpush3.msra.mxu1 %v5201_v3  ;;  %v1855_v43 = vmul.f32 %v4268_v13, %v5272_v53 }
 0x3bb   : > { %4061 = vmatprep.subr.mxu1 %v5205_v12  ;;  %v1771_v7 = vpop.xlane.xlu1 %1770 }
 0x3bc   : > { %4062 = vmatpush3.msra.mxu1 %v5205_v12  ;;  %4038 = vmatprep.mubr.msk.f32.mxu1 %vm553_vm1, %v1855_v43  ;;  %4273 = vrcp.f32 %v1771_v7 }
 0x3bd   : > { %4083 = vmatprep.subr.mxu1 %v5209_v9  ;;  %4039 = vmatmul.mubr.msk.f32.gmra.mxu1 %vm553_vm1, %v1856_v49  ;;  %v4270_v46 = vpop.eup %4269 }
 0x3be   : > { %v1858_v53 = vmul.f32 %v4270_v46, %v5278_v30 }
 0x3bf   : > { %v1756_v60 = vpop.xlane.xlu1 %1755 }
 0x3c0   : > { %4275 = vrcp.f32 %v1756_v60  ;;  %v1762_v12 = vpop.xlane.xlu0 %1761 }
 0x3c3   : > { %v1780_v5 = vpop.xlane.xlu1 %1779 }
 0x3c5   : > { %v4272_v52 = vpop.eup %4271 }
 0x3c6   : > { %v1857_v3 = vmul.f32 %v4272_v52, %v5289_v28 }
 0x3c7   : > { %v1753_v55 = vpop.xlane.xlu1 %1752 }
 0x3c8   : > { %4277 = vrcp.f32 %v1753_v55  ;;  %4049 = vmatprep.mubr.msk.f32.mxu0 %vm553_vm1, %v1857_v3  ;;  %v5945_v3 = vld [vmem:[#allocation14_spill] sm:$0xff] }
 0x3c9   : > { %4050 = vmatmul.mubr.msk.f32.vlgmr.msra.gmra.mxu0 %vm553_vm1, %v1858_v53  ;;  %4279 = vrcp.f32 %v1774_v37 }
 0x3ca   : > { %4070 = vmatpush3.msra.mxu0 %v5207_v16  ;;  %v4274_v16 = vpop.eup %4273 }
 0x3cb   : > { %4071 = vmatprep.subr.mxu0 %v5211_v18  ;;  %v1777_v31 = vpop.xlane.xlu1 %1776  ;;  %v1865_v51 = vmul.f32 %v4274_v16, %v5294_v11 }
 0x3cc   : > { %4072 = vmatpush3.msra.mxu0 %v5211_v18  ;;  %4281 = vrcp.f32 %v1777_v31 }
 0x3cd   : > { %4073 = vmatprep.subr.mxu0 %v5215_v25  ;;  %4283 = vrcp.f32 %v1780_v5  ;;  %v4276_v6 = vpop.eup %4275 }
 0x3ce   : > { %4074 = vmatpush3.msra.mxu0 %v5215_v25  ;;  %4285 = vrcp.f32 %v1762_v12  ;;  %v1860_v33 = vmul.f32 %v4276_v6, %v5300_v20 }
 0x3cf   : > { %4075 = vmatprep.subr.mxu0 %v5221_v29  ;;  %v1798_v30 = vpop.xlane.xlu0 %1797 }
 0x3d0   : > { %4076 = vmatpush3.msra.mxu0 %v5221_v29 }
 0x3d1   : > { %4097 = vmatprep.subr.mxu0 %v5225_v32 }
 0x3d3   : > { %v1759_v28 = vpop.xlane.xlu0 %1758 }
 0x3d4   : > { %4287 = vrcp.f32 %v1759_v28 }
 0x3d5   : > { %v4278_v45 = vpop.eup %4277 }
 0x3d6   : > { %v1859_v18 = vmul.f32 %v4278_v45, %v5314_v23  ;;  %v4280_v25 = vpop.eup %4279 }
 0x3d7   : > { %v1795_v1 = vpop.xlane.xlu0 %1794  ;;  %v1866_v42 = vmul.f32 %v4280_v25, %v5284_v38 }
 0x3d8   : > { %4289 = vrcp.f32 %v1795_v1  ;;  %4052 = vmatprep.mubr.msk.f32.mxu0 %vm553_vm1, %v1859_v18 }
 0x3d9   : > { %v4282_v29 = vpop.eup %4281  ;;  %4053 = vmatmul.mubr.msk.f32.gmra.mxu0 %vm553_vm1, %v1860_v33 }
 0x3da   : > { %4077 = vmatprep.mubr.msk.f32.mxu0 %vm553_vm1, %v1865_v51  ;;  %v4284_v26 = vpop.eup %4283  ;;  %v1867_v23 = vmul.f32 %v4282_v29, %v5319_v57 }
 0x3db   : > { %v1768_v14 = vpop.xlane.xlu0 %1767  ;;  %v1868_v20 = vmul.f32 %v4284_v26, %v5309_v41  ;;  %v4286_v47 = vpop.eup %4285 }
 0x3dc   : > { %4291 = vrcp.f32 %v1768_v14 }
 0x3dd   : > { %4078 = vmatmul.mubr.msk.f32.vlgmr.msra.gmra.mxu0 %vm553_vm1, %v1866_v42 }
 0x3de   : > { %4098 = vmatpush3.msra.mxu0 %v5225_v32  ;;  %4080 = vmatprep.mubr.msk.f32.mxu0 %vm553_vm1, %v1867_v23  ;;  %v1862_v32 = vmul.f32 %v4286_v47, %v5302_v58  ;;  %v5943_v58 = vld [vmem:[#allocation12_spill] sm:$0xff] }
 0x3df   : > { %4099 = vmatprep.subr.mxu0 %v5229_v36  ;;  %v1804_v11 = vpop.xlane.xlu0 %1803 }
 0x3e0   : > { %4100 = vmatpush3.msra.mxu0 %v5229_v36 }
 0x3e1   : > { %v4288_v48 = vpop.eup %4287  ;;  %4101 = vmatprep.subr.mxu0 %v5399_v15  ;;  %4081 = vmatmul.mubr.msk.f32.gmra.mxu0 %vm553_vm1, %v1868_v20  ;;  %v4447_v20 = vmov 1983009808  }
 0x3e2   : > { %4102 = vmatpush3.msra.mxu0 %v5399_v15  ;;  %v1861_v38 = vmul.f32 %v4288_v48, %v5329_v0  ;;  %v5944_v15 = vld [vmem:[#allocation13_spill] sm:$0xff]  ;;  %v2756_v47 = vunpack.c.l.s4 %v4447_v20 }
 0x3e3   : > { %v1765_v57 = vpop.xlane.xlu0 %1764 }
 0x3e4   : > { %4293 = vrcp.f32 %v1765_v57  ;;  %4063 = vmatprep.mubr.msk.f32.mxu1 %vm553_vm1, %v1861_v38  ;;  %v4448_v38 = vmov 1934713408  }
 0x3e5   : > { %v4290_v41 = vpop.eup %4289  ;;  %4064 = vmatmul.mubr.msk.f32.vlgmr.msra.gmra.mxu1 %vm553_vm1, %v1862_v32  ;;  %v1807_v27 = vpop.xlane.xlu1 %1806  ;;  %v2820_v32 = vunpack.c.l.s4 %v4448_v38 }
 0x3e6   : > { %4084 = vmatpush3.msra.mxu1 %v5209_v9  ;;  %v1873_v36 = vmul.f32 %v4290_v41, %v5335_v22  ;;  %v2757_v41 = vunpack.c.0.s8 %v2756_v47 }
 0x3e7   : > { %4085 = vmatprep.subr.mxu1 %v5213_v21  ;;  %v1801_v63 = vpop.xlane.xlu0 %1800 }
 0x3e8   : > { %4086 = vmatpush3.msra.mxu1 %v5213_v21  ;;  %4105 = vmatprep.mubr.msk.f32.mxu0 %vm553_vm1, %v1873_v36 }
 0x3e9   : > { %4087 = vmatprep.subr.mxu1 %v5219_v4  ;;  %v4292_v22 = vpop.eup %4291 }
 0x3ea   : > { %4088 = vmatpush3.msra.mxu1 %v5219_v4  ;;  %v1864_v10 = vmul.f32 %v4292_v22, %v5340_v44  ;;  %v5946_v22 = vld [vmem:[#allocation11_spill] sm:$0xff] }
 0x3eb   : > { %4089 = vmatprep.subr.mxu1 %v5943_v58  ;;  %v1786_v0 = vpop.xlane.xlu0 %1785 }
 0x3ec   : > { %4090 = vmatpush3.msra.mxu1 %v5943_v58  ;;  %4295 = vrcp.f32 %v1786_v0 }
 0x3ed   : > { %4111 = vmatprep.subr.mxu1 %v5944_v15  ;;  %v1813_v34 = vpop.xlane.xlu1 %1812 }
 0x3ef   : > { %v1783_v9 = vpop.xlane.xlu0 %1782 }
 0x3f0   : > { %4297 = vrcp.f32 %v1783_v9 }
 0x3f1   : > { %v4294_v61 = vpop.eup %4293  ;;  %4299 = vrcp.f32 %v1798_v30  ;;  %v2645_v31 = vpop.permute.xlu1 %2644 }
 0x3f2   : > { %v1863_v21 = vmul.f32 %v4294_v61, %v5351_v56  ;;  %4301 = vrcp.f32 %v1804_v11  ;;  %v5524_v61 = vsub.s32 %v2757_v41, %v5946_v22 }
 0x3f3   : > { %v1792_v37 = vpop.xlane.xlu0 %1791  ;;  %4303 = vrcp.f32 %v1801_v63 }
 0x3f4   : > { %4066 = vmatprep.mubr.msk.f32.mxu1 %vm553_vm1, %v1863_v21  ;;  %4305 = vrcp.f32 %v1807_v27 }
 0x3f5   : > { %4067 = vmatmul.mubr.msk.f32.gmra.mxu1 %vm553_vm1, %v1864_v10  ;;  %4307 = vrcp.f32 %v1792_v37 }
 0x3f7   : > { %v1789_v4 = vpop.xlane.xlu0 %1788 }
 0x3f8   : > { %4309 = vrcp.f32 %v1789_v4 }
 0x3f9   : > { %4311 = vrcp.f32 %v1813_v34  ;;  %v4296_v43 = vpop.eup %4295 }
 0x3fa   : > { %v1870_v44 = vmul.f32 %v4296_v43, %v5365_v54 }
 0x3fb   : > { %v1810_v13 = vpop.xlane.xlu0 %1809 }
 0x3fc   : > { %4313 = vrcp.f32 %v1810_v13 }
 0x3fd   : > { %v4298_v56 = vpop.eup %4297 }
 0x3fe   : > { %v1869_v7 = vmul.f32 %v4298_v56, %v5367_v39  ;;  %v4300_v60 = vpop.eup %4299 }
 0x3ff   : > { %v1816_v49 = vpop.xlane.xlu0 %1815  ;;  %v4302_v5 = vpop.eup %4301  ;;  %v1874_v39 = vmul.f32 %v4300_v60, %v5324_v8 }
 0x400   : > { %4315 = vrcp.f32 %v1816_v49  ;;  %4091 = vmatprep.mubr.msk.f32.mxu1 %vm553_vm1, %v1869_v7  ;;  %v4304_v46 = vpop.eup %4303  ;;  %v1876_v28 = vmul.f32 %v4302_v5, %v5346_v62 }
 0x401   : > { %4092 = vmatmul.mubr.msk.f32.vlgmr.msra.gmra.mxu1 %vm553_vm1, %v1870_v44  ;;  %v4306_v52 = vpop.eup %4305  ;;  %v1875_v12 = vmul.f32 %v4304_v46, %v5353_v19 }
 0x402   : > { %4112 = vmatpush3.msra.mxu1 %v5944_v15  ;;  %v4308_v55 = vpop.eup %4307  ;;  %v1877_v19 = vmul.f32 %v4306_v52, %v5358_v40  ;;  %v2821_v15 = vunpack.c.0.s8 %v2820_v32 }
 0x403   : > { %4113 = vmatprep.subr.mxu1 %v5945_v3  ;;  %v2536_v53 = vpop.permute.xlu0 %2535  ;;  %v1872_v8 = vmul.f32 %v4308_v55, %v5377_v17 }
 0x404   : > { %4114 = vmatpush3.msra.mxu1 %v5945_v3  ;;  %4103 = vmatprep.subr.mxu0 %v2536_v53  ;;  %v5531_v44 = vsub.s32 %v2821_v15, %v5946_v22 }
 0x405   : > { %v4310_v54 = vpop.eup %4309  ;;  %4115 = vmatprep.subr.mxu1 %v5395_v2  ;;  %4104 = vmatpush3.msra.mxu0 %v2536_v53 }
 0x406   : > { %4116 = vmatpush3.msra.mxu1 %v5395_v2  ;;  %4106 = vmatmul.mubr.msk.f32.vlgmr.msra.gmra.mxu0 %vm553_vm1, %v1874_v39  ;;  %v1871_v30 = vmul.f32 %v4310_v54, %v5381_v35  ;;  %v4312_v16 = vpop.eup %4311 }
 0x407   : > { %4117 = vmatprep.subr.mxu1 %v2645_v31  ;;  %4108 = vmatprep.mubr.msk.f32.mxu0 %vm553_vm1, %v1875_v12  ;;  %v1879_v35 = vmul.f32 %v4312_v16, %v5371_v24 }
 0x408   : > { %4118 = vmatpush3.msra.mxu1 %v2645_v31  ;;  %4094 = vmatprep.mubr.msk.f32.mxu1 %vm553_vm1, %v1871_v30 }
 0x409   : > { %v4314_v6 = vpop.eup %4313  ;;  %4095 = vmatmul.mubr.msk.f32.gmra.mxu1 %vm553_vm1, %v1872_v8 }
 0x40a   : > { %v1878_v2 = vmul.f32 %v4314_v6, %v5385_v50  ;;  %4109 = vmatmul.mubr.msk.f32.gmra.mxu0 %vm553_vm1, %v1876_v28  ;;  %4119 = vmatprep.mubr.msk.f32.mxu1 %vm553_vm1, %v1877_v19 }
 0x40d   : > { %v4316_v17 = vpop.eup %4315  ;;  %4120 = vmatmul.mubr.msk.f32.vlgmr.msra.gmra.mxu1 %vm553_vm1, %v1878_v2 }
 0x40e   : > { %4122 = vmatprep.mubr.msk.f32.mxu1 %vm553_vm1, %v1879_v35  ;;  %v1880_v62 = vmul.f32 %v4316_v17, %v5389_v59 }
 0x411   : > { %4123 = vmatmul.mubr.msk.f32.gmra.mxu1 %vm553_vm1, %v1880_v62 }
 0x465   : > { %v4023_v40 = vpop.f32.mrf.mxu0 }
 0x467   : > { %v1971_v45 = vpop.f32.mrf.mxu0 }
 0x46d   : > { %v4026_v18 = vpop.f32.mrf.mxu0 }
 0x46f   : > { %v1981_v1 = vpop.f32.mrf.mxu0 }
 0x475   : > { %v4037_v33 = vpop.f32.mrf.mxu1 }
 0x477   : > { %v2080_v51 = vpop.f32.mrf.mxu1 }
 0x47d   : > { %v5507_v42 = vpop.f32.mrf.mxu1 }
 0x47f   : > { %v5509_v14 = vpop.f32.mrf.mxu1 }
 0x489   : > { %v4051_v50 = vpop.f32.mrf.mxu0 }
 0x48a   : > { %v2889_v21 = vcombine.low %v4023_v40, %v4051_v50  ;;  %v2890_v27 = vcombine.high %v4023_v40, %v4051_v50 }
 0x48b   : > { %v2189_v25 = vpop.f32.mrf.mxu0 }
 0x48c   : > { %v2753_v37 = vcombine.low %v1971_v45, %v2189_v25  ;;  %v2754_v10 = vcombine.high %v1971_v45, %v2189_v25  ;;  %v2897_v5 = vrot.slane %v2889_v21, %v5524_v61  ;;  %v2904_v46 = vrot.slane %v2890_v27, %v5524_v61 }
 0x48e   : > { %v5538_v55 = vrot.slane %v2753_v37, %v5524_v61  ;;  %v5541_v39 = vrot.slane %v2754_v10, %v5524_v61 }
 0x499   : > { %v4054_v29 = vpop.f32.mrf.mxu0 }
 0x49a   : > { %v3161_v4 = vcombine.low %v4026_v18, %v4054_v29  ;;  %v3162_v34 = vcombine.high %v4026_v18, %v4054_v29 }
 0x49b   : > { %v2199_v24 = vpop.f32.mrf.mxu0 }
 0x49c   : > { %v3025_v49 = vcombine.low %v1981_v1, %v2199_v24  ;;  %v3026_v60 = vcombine.high %v1981_v1, %v2199_v24  ;;  %v5544_v54 = vrot.slane %v3161_v4, %v5524_v61  ;;  %v5547_v12 = vrot.slane %v3162_v34, %v5524_v61 }
 0x49d   : > { %v5511_v23 = vpop.f32.mrf.mxu0 }
 0x49e   : > { %v5550_v6 = vrot.slane %v3025_v49, %v5524_v61  ;;  %v5553_v2 = vrot.slane %v3026_v60, %v5524_v61 }
 0x49f   : > { %v5513_v11 = vpop.f32.mrf.mxu0 }
 0x4a1   : > { %v5517_v57 = vpop.f32.mrf.mxu0 }
 0x4a3   : > { %v5521_v9 = vpop.f32.mrf.mxu0 }
 0x4a5   : > { %v4065_v26 = vpop.f32.mrf.mxu1 }
 0x4a6   : > { %v2905_v63 = vcombine.low %v4037_v33, %v4065_v26  ;;  %v2906_v58 = vcombine.high %v4037_v33, %v4065_v26 }
 0x4a7   : > { %v2298_v59 = vpop.f32.mrf.mxu1 }
 0x4a8   : > { %v2913_v43 = vrot.slane %v2905_v63, %v5524_v61  ;;  %v2920_v56 = vrot.slane %v2906_v58, %v5524_v61  ;;  %v2769_v52 = vcombine.low %v2080_v51, %v2298_v59  ;;  %v2770_v3 = vcombine.high %v2080_v51, %v2298_v59 }
 0x4aa   : > { %v2953_v30 = vcombine.low %v2897_v5, %v2913_v43  ;;  %v2954_v8 = vcombine.high %v2897_v5, %v2913_v43  ;;  %v2969_v16 = vcombine.low %v2904_v46, %v2920_v56  ;;  %v2970_v28 = vcombine.high %v2904_v46, %v2920_v56 }
 0x4ab   : > { %v5558_v62 = vrot.slane %v2769_v52, %v5524_v61  ;;  %v5561_v40 = vrot.slane %v2770_v3, %v5524_v61 }
 0x4ac   : > { %v5572_v24 = vrot.slane %v2953_v30, %v5531_v44  ;;  %v5575_v26 = vrot.slane %v2954_v8, %v5531_v44 }
 0x4ad   : > { %v2817_v38 = vcombine.low %v5538_v55, %v5558_v62  ;;  %v2833_v32 = vcombine.low %v5541_v39, %v5561_v40 }
 0x4b5   : > { %v5515_v48 = vpop.f32.mrf.mxu1 }
 0x4b6   : > { %v3177_v45 = vcombine.low %v5507_v42, %v5515_v48  ;;  %v3178_v18 = vcombine.high %v5507_v42, %v5515_v48  ;;  %v5581_v42 = vrot.slane %v2970_v28, %v5531_v44 }
 0x4b7   : > { %v5519_v36 = vpop.f32.mrf.mxu1 }
 0x4b8   : > { %v3041_v50 = vcombine.low %v5509_v14, %v5519_v36  ;;  %v3042_v33 = vcombine.high %v5509_v14, %v5519_v36  ;;  %v5592_v41 = vrot.slane %v3177_v45, %v5524_v61  ;;  %v5595_v36 = vrot.slane %v3178_v18, %v5524_v61 }
 0x4ba   : > { %v5598_v58 = vrot.slane %v3041_v50, %v5524_v61 }
 0x4c1   : > { %v4093_v0 = vpop.f32.mrf.mxu1 }
 0x4c3   : > { %v5528_v7 = vpop.f32.mrf.mxu1 }
 0x4c6   : > { %v4107_v13 = vpop.f32.mrf.mxu0 }
 0x4c7   : > { %v2921_v35 = vcombine.low %v5511_v23, %v4107_v13  ;;  %v2922_v17 = vcombine.high %v5511_v23, %v4107_v13  ;;  %v5578_v23 = vrot.slane %v2969_v16, %v5531_v44 }
 0x4c8   : > { %v2625_v31 = vpop.f32.mrf.mxu0 }
 0x4c9   : > { %v5535_v53 = vpop.f32.mrf.mxu1  ;;  %v2929_v20 = vrot.slane %v2921_v35, %v5524_v61  ;;  %v2936_v14 = vrot.slane %v2922_v17, %v5524_v61  ;;  %v2785_v27 = vcombine.low %v5513_v11, %v2625_v31  ;;  %v2786_v13 = vcombine.high %v5513_v11, %v2625_v31 }
 0x4ca   : > { %v4110_v25 = vpop.f32.mrf.mxu0 }
 0x4cb   : > { %v2526_v19 = vpop.f32.mrf.mxu1  ;;  %v3194_v43 = vcombine.high %v5517_v57, %v4110_v25  ;;  %v3193_v60 = vcombine.low %v5517_v57, %v4110_v25  ;;  %v5620_v31 = vrot.slane %v2785_v27, %v5524_v61  ;;  %v2800_v16 = vrot.slane %v2786_v13, %v5524_v61 }
 0x4cc   : > { %v2635_v15 = vpop.f32.mrf.mxu0  ;;  %v5682_v27 = vrot.slane %v2833_v32, %v5531_v44 }
 0x4cd   : > { %v4121_v1 = vpop.f32.mrf.mxu1  ;;  %v3057_v5 = vcombine.low %v5521_v9, %v2635_v15  ;;  %v5631_v28 = vrot.slane %v3194_v43, %v5524_v61 }
 0x4ce   : > { %v2937_v51 = vcombine.low %v4093_v0, %v4121_v1  ;;  %v2938_v29 = vcombine.high %v4093_v0, %v4121_v1  ;;  %v5601_v0 = vrot.slane %v3042_v33, %v5524_v61  ;;  %v5648_v1 = vrot.slane %v3193_v60, %v5524_v61 }
 0x4cf   : > { %v2734_v59 = vpop.f32.mrf.mxu1  ;;  %v5651_v50 = vrot.slane %v3057_v5, %v5524_v61 }
 0x4d0   : > { %v2945_v47 = vrot.slane %v2937_v51, %v5524_v61  ;;  %v2952_v48 = vrot.slane %v2938_v29, %v5524_v61  ;;  %v2801_v37 = vcombine.low %v5528_v7, %v2734_v59  ;;  %v2802_v10 = vcombine.high %v5528_v7, %v2734_v59 }
 0x4d1   : > { %v4124_v63 = vpop.f32.mrf.mxu1  ;;  %v3058_v7 = vcombine.high %v5521_v9, %v2635_v15  ;;  %v3225_v51 = vcombine.low %v5544_v54, %v5592_v41  ;;  %v3105_v15 = vcombine.low %v5553_v2, %v5601_v0 }
 0x4d2   : > { %v2985_v22 = vcombine.low %v2929_v20, %v2945_v47  ;;  %v3001_v21 = vcombine.low %v2936_v14, %v2952_v48  ;;  %v3210_v4 = vcombine.high %v5535_v53, %v4124_v63  ;;  %v3002_v56 = vcombine.high %v2936_v14, %v2952_v48 }
 0x4d3   : > { %v2744_v34 = vpop.f32.mrf.mxu1  ;;  %v3209_v49 = vcombine.low %v5535_v53, %v4124_v63  ;;  %v2986_v3 = vcombine.high %v2929_v20, %v2945_v47  ;;  %v5623_v53 = vrot.slane %v2801_v37, %v5524_v61  ;;  %v2816_v57 = vrot.slane %v2802_v10, %v5524_v61 }
 0x4d4   : > { %v5613_v46 = vrot.slane %v2985_v22, %v5531_v44  ;;  %v5616_v52 = vrot.slane %v3001_v21, %v5531_v44  ;;  %v3073_v30 = vcombine.low %v2526_v19, %v2744_v34  ;;  %v3074_v11 = vcombine.high %v2526_v19, %v2744_v34 }
 0x4d5   : > { %v5627_v8 = vrot.slane %v3210_v4, %v5524_v61  ;;  %v3016_v9 = vrot.slane %v3002_v56, %v5531_v44  ;;  %v5635_v19 = vrot.slane %v3209_v49, %v5524_v61  ;;  %v5654_v33 = vrot.slane %v3058_v7, %v5524_v61 }
 0x4d6   : > { %v5638_v35 = vrot.slane %v3073_v30, %v5524_v61  ;;  %v5641_v17 = vrot.slane %v3074_v11, %v5524_v61  ;;  %v3022_v45 = vcombine.high %v5578_v23, %v5616_v52  ;;  %v3018_v18 = vcombine.high %v5572_v24, %v5613_v46 }
 0x4d7   : > { %v3000_v25 = vrot.slane %v2986_v3, %v5531_v44  ;;  %v2849_v29 = vcombine.low %v5620_v31, %v5623_v53  ;;  %v2865_v59 = vcombine.low %v2800_v16, %v2816_v57  ;;  %v3273_v20 = vcombine.low %v5631_v28, %v5627_v8 }
 0x4d8   : > { %3334 = vrot.lane.b32.xlu1 %v3022_v45, %s4449_s25  ;;  %v3241_v14 = vcombine.low %v5547_v12, %v5595_v36  ;;  %v3257_v61 = vcombine.low %v5648_v1, %v5635_v19  ;;  %v3121_v47 = vcombine.low %v5651_v50, %v5638_v35  ;;  %v3137_v48 = vcombine.low %v5654_v33, %v5641_v17 }
 0x4d9   : > { %3322 = vrot.lane.b32.xlu0 %v3018_v18, %s4449_s25  ;;  %v3089_v63 = vcombine.low %v5550_v6, %v5598_v58  ;;  %v3023_v22 = vcombine.low %v5581_v42, %v3016_v9  ;;  %v5679_v21 = vrot.slane %v2817_v38, %v5531_v44  ;;  %v3019_v37 = vcombine.low %v5575_v26, %v3000_v25 }
 0x4da   : > { %v5686_v10 = vrot.slane %v3225_v51, %v5531_v44  ;;  %v5689_v4 = vrot.slane %v2849_v29, %v5531_v44  ;;  %v5692_v34 = vrot.slane %v2865_v59, %v5531_v44  ;;  %v5695_v13 = vrot.slane %v3273_v20, %v5531_v44 }
 0x4db   : > { %v5699_v38 = vrot.slane %v3241_v14, %v5531_v44  ;;  %v5702_v32 = vrot.slane %v3257_v61, %v5531_v44  ;;  %v5705_v43 = vrot.slane %v3121_v47, %v5531_v44  ;;  %v5708_v56 = vrot.slane %v3137_v48, %v5531_v44 }
 0x4dc   : > { %3338 = vrot.lane.b32.xlu1 %v3023_v22, %s4446_s17  ;;  %v5712_v49 = vrot.slane %v3089_v63, %v5531_v44  ;;  %v5715_v60 = vrot.slane %v3105_v15, %v5531_v44  ;;  %v2866_v5 = vcombine.high %v2800_v16, %v2816_v57  ;;  %v3024_v7 = vcombine.high %v5581_v42, %v3016_v9 }
 0x4dd   : > { %3326 = vrot.lane.b32.xlu0 %v3019_v37, %s4446_s17  ;;  %v2850_v3 = vcombine.high %v5620_v31, %v5623_v53  ;;  %v3020_v30 = vcombine.high %v5575_v26, %v3000_v25  ;;  %v3021_v11 = vcombine.low %v5578_v23, %v5616_v52  ;;  %v3017_v45 = vcombine.low %v5572_v24, %v5613_v46 }
 0x4de   : > { %v2834_v18 = vcombine.high %v5541_v39, %v5561_v40  ;;  %v2885_v57 = vcombine.low %v5682_v27, %v5692_v34  ;;  %v2881_v42 = vcombine.low %v5679_v21, %v5689_v4  ;;  %v3293_v26 = vcombine.low %v5699_v38, %v5695_v13 }
 0x4df   : > { %v2818_v31 = vcombine.high %v5538_v55, %v5558_v62  ;;  %v3289_v53 = vcombine.low %v5686_v10, %v5702_v32  ;;  %v3157_v39 = vcombine.low %v5715_v60, %v5708_v56  ;;  %v3153_v40 = vcombine.low %v5712_v49, %v5705_v43 }
 0x4e0   : > { %3342 = vrot.lane.b32.xlu1 %v3024_v7, %s4445_s15  ;;  %v2880_v16 = vrot.slane %v2866_v5, %v5531_v44  ;;  %v2886_v9 = vcombine.high %v5682_v27, %v5692_v34  ;;  %v2864_v25 = vrot.slane %v2850_v3, %v5531_v44  ;;  %v2882_v55 = vcombine.high %v5679_v21, %v5689_v4 }
 0x4e1   : > { %3330 = vrot.lane.b32.xlu0 %v3020_v30, %s4445_s15  ;;  %v2848_v62 = vrot.slane %v2834_v18, %v5531_v44  ;;  %v2832_v51 = vrot.slane %v2818_v31, %v5531_v44  ;;  %v3274_v20 = vcombine.high %v5631_v28, %v5627_v8  ;;  %v3258_v61 = vcombine.high %v5648_v1, %v5635_v19 }
 0x4e2   : > { %v3242_v48 = vcombine.high %v5547_v12, %v5595_v36  ;;  %v3226_v63 = vcombine.high %v5544_v54, %v5592_v41  ;;  %v3294_v8 = vcombine.high %v5699_v38, %v5695_v13  ;;  %v3290_v19 = vcombine.high %v5686_v10, %v5702_v32 }
 0x4e3   : > { %v2887_v29 = vcombine.low %v2848_v62, %v2880_v16  ;;  %v2883_v59 = vcombine.low %v2832_v51, %v2864_v25  ;;  %v2888_v14 = vcombine.high %v2848_v62, %v2880_v16  ;;  %v2884_v47 = vcombine.high %v2832_v51, %v2864_v25 }
 0x4e4   : > { %3310 = vrot.lane.b32.xlu1 %v2886_v9, %s4449_s25  ;;  %v3288_v15 = vrot.slane %v3274_v20, %v5531_v44  ;;  %v3272_v28 = vrot.slane %v3258_v61, %v5531_v44  ;;  %v3256_v1 = vrot.slane %v3242_v48, %v5531_v44  ;;  %v3240_v12 = vrot.slane %v3226_v63, %v5531_v44 }
 0x4e5   : > { %3298 = vrot.lane.b32.xlu0 %v2882_v55, %s4449_s25  ;;  %v3138_v54 = vcombine.high %v5654_v33, %v5641_v17  ;;  %v3122_v36 = vcombine.high %v5651_v50, %v5638_v35  ;;  %v3106_v37 = vcombine.high %v5553_v2, %v5601_v0  ;;  %v3090_v5 = vcombine.high %v5550_v6, %v5598_v58 }
 0x4e6   : > { %v3295_v41 = vcombine.low %v3256_v1, %v3288_v15  ;;  %v3291_v22 = vcombine.low %v3240_v12, %v3272_v28  ;;  %v3158_v17 = vcombine.high %v5715_v60, %v5708_v56  ;;  %v3154_v35 = vcombine.high %v5712_v49, %v5705_v43 }
 0x4e7   : > { %v3152_v7 = vrot.slane %v3138_v54, %v5531_v44  ;;  %v3136_v33 = vrot.slane %v3122_v36, %v5531_v44  ;;  %v3120_v50 = vrot.slane %v3106_v37, %v5531_v44  ;;  %v3104_v2 = vrot.slane %v3090_v5, %v5531_v44 }
 0x4e8   : > { %3314 = vrot.lane.b32.xlu1 %v2887_v29, %s4446_s17  ;;  %v3296_v30 = vcombine.high %v3256_v1, %v3288_v15  ;;  %v3292_v18 = vcombine.high %v3240_v12, %v3272_v28 }
 0x4e9   : > { %3302 = vrot.lane.b32.xlu0 %v2883_v59, %s4446_s17  ;;  %v3159_v6 = vcombine.low %v3120_v50, %v3152_v7  ;;  %v3155_v58 = vcombine.low %v3104_v2, %v3136_v33  ;;  %v3160_v0 = vcombine.high %v3120_v50, %v3152_v7  ;;  %v3156_v3 = vcombine.high %v3104_v2, %v3136_v33 }
 0x4ec   : > { %3318 = vrot.lane.b32.xlu1 %v2888_v14, %s4445_s15 }
 0x4ed   : > { %3306 = vrot.lane.b32.xlu0 %v2884_v47, %s4445_s15 }
 0x4f0   : > { %3382 = vrot.lane.b32.xlu1 %v3294_v8, %s4449_s25 }
 0x4f1   : > { %3370 = vrot.lane.b32.xlu0 %v3290_v19, %s4449_s25 }
 0x4f4   : > { %3386 = vrot.lane.b32.xlu1 %v3295_v41, %s4446_s17 }
 0x4f5   : > { %3374 = vrot.lane.b32.xlu0 %v3291_v22, %s4446_s17 }
 0x4f8   : > { %3358 = vrot.lane.b32.xlu1 %v3158_v17, %s4449_s25 }
 0x4f9   : > { %3346 = vrot.lane.b32.xlu0 %v3154_v35, %s4449_s25 }
 0x4fc   : > { %3362 = vrot.lane.b32.xlu1 %v3159_v6, %s4446_s17 }
 0x4fd   : > { %3350 = vrot.lane.b32.xlu0 %v3155_v58, %s4446_s17 }
 0x500   : > { %3366 = vrot.lane.b32.xlu1 %v3160_v0, %s4445_s15 }
 0x501   : > { %3354 = vrot.lane.b32.xlu0 %v3156_v3, %s4445_s15 }
 0x504   : > { %3390 = vrot.lane.b32.xlu1 %v3296_v30, %s4445_s15 }
 0x505   : > { %3378 = vrot.lane.b32.xlu0 %v3292_v18, %s4445_s15 }
 0x54a   : > { %v3335_v44 = vpop.permute.xlu1 %3334 }
 0x54b   : > { %v3323_v31 = vpop.permute.xlu0 %3322  ;;  %v3403_v25 = vsel %vm553_vm1, %v3021_v11, %v3335_v44 }
 0x54c   : > { %v3400_v55 = vsel %vm553_vm1, %v3017_v45, %v3323_v31 }
 0x54e   : > { %v3339_v16 = vpop.permute.xlu1 %3338 }
 0x54f   : > { %v3327_v9 = vpop.permute.xlu0 %3326  ;;  %v3404_v62 = vsel %vm219_vm0, %v3403_v25, %v3339_v16 }
 0x550   : > { %v3401_v29 = vsel %vm219_vm0, %v3400_v55, %v3327_v9 }
 0x552   : > { %v3343_v51 = vpop.permute.xlu1 %3342 }
 0x553   : > { %v3405_v59 = vsel %vm3395_vm6, %v3404_v62, %v3343_v51  ;;  %v3331_v20 = vpop.permute.xlu0 %3330 }
 0x554   : > { %3421 = vst [vmem:[%s5813_s8 + $0x18] sm:$0xff] %v3405_v59  ;;  %v3402_v23 = vsel %vm3395_vm6, %v3401_v29, %v3331_v20 }
 0x555   : > { %3420 = vst [vmem:[%s5813_s8 + $0x10] sm:$0xff] %v3402_v23 }
 0x556   : > { %v3311_v24 = vpop.permute.xlu1 %3310 }
 0x557   : > { %v3299_v46 = vpop.permute.xlu0 %3298  ;;  %v3397_v45 = vsel %vm553_vm1, %v2885_v57, %v3311_v24 }
 0x558   : > { %v3393_v14 = vsel %vm553_vm1, %v2881_v42, %v3299_v46 }
 0x55a   : > { %v3315_v52 = vpop.permute.xlu1 %3314 }
 0x55b   : > { %v3303_v11 = vpop.permute.xlu0 %3302  ;;  %v3398_v61 = vsel %vm219_vm0, %v3397_v45, %v3315_v52 }
 0x55c   : > { %v3394_v48 = vsel %vm219_vm0, %v3393_v14, %v3303_v11 }
 0x55e   : > { %v3319_v47 = vpop.permute.xlu1 %3318 }
 0x55f   : > { %v3399_v63 = vsel %vm3395_vm6, %v3398_v61, %v3319_v47  ;;  %v3307_v15 = vpop.permute.xlu0 %3306 }
 0x560   : > { %3419 = vst [vmem:[%s5813_s8 + $0x8] sm:$0xff] %v3399_v63  ;;  %v3396_v8 = vsel %vm3395_vm6, %v3394_v48, %v3307_v15 }
 0x561   : > { %3418 = vst [vmem:[%s5813_s8] sm:$0xff] %v3396_v8 }
 0x562   : > { %v3383_v27 = vpop.permute.xlu1 %3382 }
 0x563   : > { %v3371_v34 = vpop.permute.xlu0 %3370  ;;  %v3415_v43 = vsel %vm553_vm1, %v3293_v26, %v3383_v27 }
 0x564   : > { %v3412_v49 = vsel %vm553_vm1, %v3289_v53, %v3371_v34 }
 0x566   : > { %v3387_v57 = vpop.permute.xlu1 %3386 }
 0x567   : > { %v3375_v21 = vpop.permute.xlu0 %3374  ;;  %v3416_v60 = vsel %vm219_vm0, %v3415_v43, %v3387_v57 }
 0x56a   : > { %v3359_v4 = vpop.permute.xlu1 %3358 }
 0x56b   : > { %v3347_v42 = vpop.permute.xlu0 %3346  ;;  %v3409_v1 = vsel %vm553_vm1, %v3157_v39, %v3359_v4 }
 0x56c   : > { %v3406_v12 = vsel %vm553_vm1, %v3153_v40, %v3347_v42  ;;  %v3413_v40 = vsel %vm219_vm0, %v3412_v49, %v3375_v21 }
 0x56e   : > { %v3363_v28 = vpop.permute.xlu1 %3362 }
 0x56f   : > { %v3351_v19 = vpop.permute.xlu0 %3350  ;;  %v3410_v54 = vsel %vm219_vm0, %v3409_v1, %v3363_v28 }
 0x570   : > { %v3407_v36 = vsel %vm219_vm0, %v3406_v12, %v3351_v19 }
 0x572   : > { %v3367_v41 = vpop.permute.xlu1 %3366 }
 0x573   : > { %v3411_v22 = vsel %vm3395_vm6, %v3410_v54, %v3367_v41  ;;  %v3355_v37 = vpop.permute.xlu0 %3354 }
 0x574   : > { %3423 = vst [vmem:[%s5813_s8 + $0x28] sm:$0xff] %v3411_v22  ;;  %v3408_v56 = vsel %vm3395_vm6, %v3407_v36, %v3355_v37 }
 0x575   : > { %3422 = vst [vmem:[%s5813_s8 + $0x20] sm:$0xff] %v3408_v56 }
 0x576   : > { %v3391_v39 = vpop.permute.xlu1 %3390 }
 0x577   : > { %v3417_v5 = vsel %vm3395_vm6, %v3416_v60, %v3391_v39  ;;  %v3379_v7 = vpop.permute.xlu0 %3378 }
 0x578   : > { %3425 = vst [vmem:[%s5813_s8 + $0x38] sm:$0xff] %v3417_v5  ;;  %v3414_v10 = vsel %vm3395_vm6, %v3413_v40, %v3379_v7 }
 0x579   : > { %3424 = vst [vmem:[%s5813_s8 + $0x30] sm:$0xff] %v3414_v10 }
 0x57a   : > { %4384 = shalt.err (!%p4381_p0)
}
 0x57b   : > { %s4385_s7 = scalar_lea.hbm %s5862_s27, 1024  ;;  %s4389_s23 = scalar_lea.hbm %s5910_s2, 2048 }
 0x57c   : > { %p4386_p5 = scmp.ne.s32.totalorder %s5862_s27, %s4385_s7  ;;  %p4390_p4 = scmp.lt.s32.totalorder %s5862_s27, %s5910_s2 }
 0x57d   : > { %p4391_p6 = scmp.lt.s32.totalorder %s4389_s23, %s4385_s7 }
 0x57e   : > { %p4387_p2 = pnand %p4386_p5, %p5947_p11 }
 0x57f   : > { %p4392_p8 = por %p4391_p6, %p4390_p4 }
 0x580   : > { %p4388_p1 = pneg %p4387_p2 }
 0x582   : > { %p4393_p3 = pnand %p4392_p8, %p4388_p1 }
 0x584   : > { %4396 = shalt.err (!%p4393_p3)
}
 0x585   : > { %4131 = dma.vmem_to_hbm [thread:$0]  (%p5947_p11), %s5864_s19, 1024, %s5862_s27, %s3427_s28  }
 0x586 PF: > { %s3453_s17 = sand.u32 1, %s4427_s9   ;;  %p5948_p7 = scmp.ne.s32.totalorder %s5921_s16, 0 }
 0x587   : > { %p5949_p9 = scmp.ge.s32.totalorder %s4439_s12, 2  ;;  %s3454_s25 = scalar_lea.sflag [#allocation4], %s3453_s17 }
 0x589   : > { %p4142_p10 = pnand %p5949_p9, %p5948_p7 }
 0x58b   : > { %p4143_p12 = pneg %p4142_p10 }
 0x58d   : > { %4422 = dma.done.wait (%p4143_p12), %s3454_s25, 1024  }
 0x58e   : > { %4424 = vsyncadd (%p4143_p12), %s3454_s25, 4294966272  ;;  %p16_p13 = scmp.ge.s32.totalorder %s4520_s21, 4   ;;  %s5950_s9 = smov %s4431_s10 }
 0x58f   : > { %s5951_s10 = smov %s4435_s11  ;;  %s5952_s11 = smov %s4540_s29 }
 0x590   : > { %s5953_s12 = smov %s4520_s21  ;;  %18 = sbr.rel (!%p16_p13) target bundleno = 6 (0x6), region = 77 }
 0x595   :  { %3459 = vsyncpa [#allocation3], 1 }
 0x596   :  { %3461 = vsyncpa [#allocation3 + $0x1], 1 }
 0x597   :  { %3462 = vsyncpa [#allocation6], 1 }
 0x598   :  { %3463 = vsyncpa [#allocation4], 1 }
 0x599   :  { %3465 = vsyncpa [#allocation4 + $0x1], 1 }

</bundles_post_ra>
